<compile_context>
chip_gen: v5e
topology: v5e:2x2
jax: 0.10.0
libtpu: 0.0.40
codegen_flags: <defaults>
</compile_context>

<pallas_src>
import functools

import jax
import jax.numpy as jnp
import numpy as np
from jax import lax
from jax.experimental import pallas as pl
from jax.experimental.pallas import tpu as pltpu


def _rup(x, m):
    return (x + m - 1) // m * m


def _rup8(x):
    return _rup(x, 8)


# ----------------------------------------------------------------------------
# Fused kernel (per batch-tile grid step)
# ----------------------------------------------------------------------------
def _block_b_kernel(x_ref, w1_ref, b1_ref, m1_ref, w2_ref, b2_ref, m2_ref,
                    w3_ref, b3_ref, o_ref, pool_ref, *,
                    bt, offs1, offs2, W2, N1, N2, LD, ho, wo):
    f32 = jnp.float32
    # hoist weight / bias / mask loads out of the per-batch loop
    w1 = [w1_ref[t] for t in range(9)]
    w2 = [w2_ref[t] for t in range(9)]
    w3 = w3_ref[...]
    b1 = b1_ref[...]
    b2 = b2_ref[...]
    b3 = b3_ref[...]
    m1 = m1_ref[...]
    m2 = m2_ref[...]
    cout_p = b1.shape[0]

    for b in range(bt):
        # --- conv1(3x3, dil 2, pad 2) + BN1 + ReLU + 2x2/2 avg-pool, fused via
        #     the 4 parity planes (dilation-2 conv decomposes over parities).
        pooled = jnp.zeros((cout_p, N1), f32)
        for p in range(4):
            a = jnp.zeros((cout_p, N1), f32)
            for t, off in enumerate(offs1):
                a += jnp.dot(w1[t], x_ref[b, p, :, off:off + N1],
                             preferred_element_type=f32)
            pooled += jnp.maximum(a + b1, 0.0)
        # mask -> exactly the zero-padded conv2 input layout (row width W2)
        pooled = (0.25 * pooled) * m1
        pool_ref[...] = pooled.astype(pool_ref.dtype)

        # --- conv2(3x3, dil 2, pad 2) + BN2 + ReLU
        a2 = jnp.zeros((cout_p, N2), f32)
        for t, off in enumerate(offs2):
            a2 += jnp.dot(w2[t], pool_ref[:, off:off + N2],
                          preferred_element_type=f32)
        # zero everything outside the valid image (valid because post-ReLU >= 0,
        # so zero padding == PyTorch's -inf maxpool padding).
        r2 = jnp.maximum(a2 + b2, 0.0) * m2

        # --- 3x3 stride-1 max-pool, separable (columns then rows)
        span = LD + 2 * W2
        cm = jnp.maximum(jnp.maximum(r2[:, 0:span], r2[:, 1:span + 1]),
                         r2[:, 2:span + 2])
        mx = jnp.maximum(jnp.maximum(cm[:, 0:LD], cm[:, W2:W2 + LD]),
                         cm[:, 2 * W2:2 * W2 + LD])

        # --- conv3 (1x1) + ReLU
        y = jnp.maximum(
            jnp.dot(w3, mx.astype(w3.dtype), preferred_element_type=f32) + b3,
            0.0)

        # --- compact output: drop the (W2 - wo) junk columns per row so the
        #     stored lane axis is exactly ho*wo (lane-dense single store).
        o_ref[b] = jnp.concatenate(
            [y[:, r * W2:r * W2 + wo] for r in range(ho)], axis=1
        ).astype(o_ref.dtype)


# ----------------------------------------------------------------------------
# Wrapper glue
# ----------------------------------------------------------------------------
def _build_planes(x, cin_p, W2, lead1, L1):
    """x (n,cin,H,W) -> (n, 4, cin_p, L1) bf16 parity planes in flat lane layout.

    Each parity plane gets a 1-pixel zero ring (== conv1's dilation-2 pad-2 on
    the parity grid), row width padded to W2, flattened, and shifted by lead1
    leading zero lanes so the conv output lands directly in the conv2-padded
    pooled layout."""
    n, cin, h, w = x.shape
    ho, wo = h // 2, w // 2
    xb = x.astype(jnp.bfloat16)
    planes = jnp.stack([xb[:, :, pr::2, pc::2]
                        for pr in (0, 1) for pc in (0, 1)], axis=1)
    planes = jnp.pad(planes, ((0, 0), (0, 0), (0, cin_p - cin), (1, 1), (1, 1)))
    planes = jnp.pad(planes,
                     ((0, 0), (0, 0), (0, 0), (0, 0), (0, W2 - (wo + 2))))
    planes = planes.reshape(n, 4, cin_p, (ho + 2) * W2)
    tail = L1 - lead1 - (ho + 2) * W2
    return jnp.pad(planes, ((0, 0), (0, 0), (0, 0), (lead1, tail)))


def _mask(length, lead, W2, ho, wo):
    idx = np.arange(length)
    q = idx - lead
    m = (q >= 0) & (q // W2 < ho) & (q % W2 < wo)
    return jnp.asarray(m.astype(np.float32)[None, :])


def _pick_batch_tile(n, per_elem_bytes, budget=4 << 20):
    cap = max(1, n // 2)            # keep >=2 grid steps for megacore when n>=2
    best = 1
    for cand in range(1, min(cap, 8) + 1):
        if n % cand == 0 and cand * per_elem_bytes <= budget:
            best = cand
    return best


def pack_params(p, cin, cout, clast):
    """Fold eval-mode BN into the conv weights and pack per-tap bf16 matrices.

    Called ONCE per parameter set, outside the jitted forward."""
    cin_p, cout_p, clast_p = _rup8(cin), _rup8(cout), _rup8(clast)

    def taps(w, scale, ci, ci_p, co_p):
        co = w.shape[3]
        wt = w * scale[None, None, None, :]
        wt = jnp.transpose(wt, (0, 1, 3, 2)).reshape(9, co, ci)
        wt = jnp.pad(wt, ((0, 0), (0, co_p - co), (0, ci_p - ci)))
        return wt.astype(jnp.bfloat16)

    w1t = taps(p["w1"], p["s1"], cin, cin_p, cout_p)
    w2t = taps(p["w2"], p["s2"], cout, cout_p, cout_p)
    b1 = jnp.pad(p["b1"] * p["s1"] + p["t1"], (0, cout_p - cout)).reshape(cout_p, 1)
    b2 = jnp.pad(p["b2"] * p["s2"] + p["t2"], (0, cout_p - cout)).reshape(cout_p, 1)
    w3 = jnp.pad(jnp.transpose(p["w3"]),
                 ((0, clast_p - clast), (0, cout_p - cout))).astype(jnp.bfloat16)
    b3 = jnp.pad(p["b3"], (0, clast_p - clast)).reshape(clast_p, 1)
    return dict(w1t=w1t, b1=b1, w2t=w2t, b2=b2, w3=w3, b3=b3)


def stm_renet_block_b(x_nchw, packed, *, clast):
    x = x_nchw.astype(jnp.float32)
    n, cin, h, w = x.shape
    assert h % 2 == 0 and w % 2 == 0, "even spatial dims expected (avgpool 2/2)"
    cin_p = packed["w1t"].shape[2]
    cout_p = packed["w1t"].shape[1]
    clast_p = packed["w3"].shape[0]
    ho, wo = h // 2, w // 2

    # flat-lane geometry (row width W2 shared by every stage)
    W2 = wo + 4                      # conv2-padded row width (pad 2 each side)
    lead2 = W2 + 1                   # maxpool halo lead in the relu2 layout
    lead1 = lead2 + 2 * W2 + 2       # pooled data offset == conv2-padded (2,2)
    N2 = (ho + 2) * W2               # relu2 / conv2-output span
    N1 = _rup(N2 + 2 * W2 + 2, 128)  # pooled (conv2 input) span
    L1 = _rup(N1 + 2 * W2 + 2, 128)  # parity-plane flat length
    LD = (ho - 1) * W2 + wo          # data span in the relu2 layout

    planes = _build_planes(x, cin_p, W2, lead1, L1)
    mask1 = _mask(N1, lead1, W2, ho, wo)
    mask2 = _mask(N2, lead2, W2, ho, wo)

    per_elem = (4 * cin_p * L1 * 2 + clast_p * ho * wo * 4
                + 3 * cout_p * N1 * 4 + 3 * cout_p * N2 * 4)
    bt = _pick_batch_tile(n, per_elem)

    offs1 = tuple(ky * W2 + kx for ky in range(3) for kx in range(3))
    offs2 = tuple(2 * ky * W2 + 2 * kx for ky in range(3) for kx in range(3))
    kernel = functools.partial(_block_b_kernel, bt=bt, offs1=offs1, offs2=offs2,
                               W2=W2, N1=N1, N2=N2, LD=LD, ho=ho, wo=wo)

    out = pl.pallas_call(
        kernel,
        out_shape=jax.ShapeDtypeStruct((n, clast_p, ho * wo), jnp.float32),
        grid=(n // bt,),
        in_specs=[
            pl.BlockSpec((bt, 4, cin_p, L1), lambda i: (i, 0, 0, 0)),
            pl.BlockSpec((9, cout_p, cin_p), lambda i: (0, 0, 0)),
            pl.BlockSpec((cout_p, 1), lambda i: (0, 0)),
            pl.BlockSpec((1, N1), lambda i: (0, 0)),
            pl.BlockSpec((9, cout_p, cout_p), lambda i: (0, 0, 0)),
            pl.BlockSpec((cout_p, 1), lambda i: (0, 0)),
            pl.BlockSpec((1, N2), lambda i: (0, 0)),
            pl.BlockSpec((clast_p, cout_p), lambda i: (0, 0)),
            pl.BlockSpec((clast_p, 1), lambda i: (0, 0)),
        ],
        out_specs=pl.BlockSpec((bt, clast_p, ho * wo), lambda i: (i, 0, 0)),
        scratch_shapes=[pltpu.VMEM((cout_p, N1), jnp.bfloat16)],
        compiler_params=pltpu.CompilerParams(
            dimension_semantics=("parallel",)),
    )(planes, packed["w1t"], packed["b1"], mask1,
      packed["w2t"], packed["b2"], mask2, packed["w3"], packed["b3"])

    out = out.reshape(n, clast_p, ho, wo)
    return out if clast == clast_p else out[:, :clast]


# ----------------------------------------------------------------------------
# Deterministic parameter init (shapes follow the PyTorch module) + reference
# ----------------------------------------------------------------------------
def init_params(key, cin, cout, clast):
    ks = jax.random.split(key, 14)
    nrm = lambda k, shp, s=0.1: s * jax.random.normal(k, shp, jnp.float32)
    eps = 1e-5

    def fold(g, b, m, v):
        s = g / jnp.sqrt(v + eps)
        return s, b - m * s

    g1, be1 = 1.0 + nrm(ks[2], (cout,)), nrm(ks[3], (cout,))
    m1, v1 = nrm(ks[4], (cout,)), 0.5 + jnp.abs(nrm(ks[5], (cout,)))
    s1, t1 = fold(g1, be1, m1, v1)
    g2, be2 = 1.0 + nrm(ks[8], (cout,)), nrm(ks[9], (cout,))
    m2, v2 = nrm(ks[10], (cout,)), 0.5 + jnp.abs(nrm(ks[11], (cout,)))
    s2, t2 = fold(g2, be2, m2, v2)
    return dict(
        w1=nrm(ks[0], (3, 3, cin, cout)), b1=nrm(ks[1], (cout,)), s1=s1, t1=t1,
        w2=nrm(ks[6], (3, 3, cout, cout)), b2=nrm(ks[7], (cout,)), s2=s2, t2=t2,
        w3=nrm(ks[12], (cout, clast)), b3=nrm(ks[13], (clast,)),
    )


def reference_forward(x_nchw, p):
    dn = ("NCHW", "OIHW", "NCHW")
    prec = lax.Precision.HIGHEST
    cvec = lambda v: v[None, :, None, None]

    w1 = jnp.transpose(p["w1"], (3, 2, 0, 1))
    y = lax.conv_general_dilated(x_nchw, w1, (1, 1), ((2, 2), (2, 2)),
                                 rhs_dilation=(2, 2), dimension_numbers=dn,
                                 precision=prec)
    y = jnp.maximum((y + cvec(p["b1"])) * cvec(p["s1"]) + cvec(p["t1"]), 0.0)
    y = lax.reduce_window(y, 0.0, lax.add, (1, 1, 2, 2), (1, 1, 2, 2),
                          "VALID") * 0.25
    w2 = jnp.transpose(p["w2"], (3, 2, 0, 1))
    y = lax.conv_general_dilated(y, w2, (1, 1), ((2, 2), (2, 2)),
                                 rhs_dilation=(2, 2), dimension_numbers=dn,
                                 precision=prec)
    y = jnp.maximum((y + cvec(p["b2"])) * cvec(p["s2"]) + cvec(p["t2"]), 0.0)
    y = lax.reduce_window(y, -jnp.inf, lax.max, (1, 1, 3, 3), (1, 1, 1, 1),
                          ((0, 0), (0, 0), (1, 1), (1, 1)))
    w3 = jnp.transpose(p["w3"], (1, 0))[:, :, None, None]
    y = lax.conv_general_dilated(y, w3, (1, 1), "VALID", dimension_numbers=dn,
                                 precision=prec)
    return jnp.maximum(y + cvec(p["b3"]), 0.0)


if __name__ == "__main__":
    N, CIN, COUT, CLAST, H, W = 2, 4, 8, 16, 16, 16
    key = jax.random.PRNGKey(0)
    kp, kx = jax.random.split(key)
    params = init_params(kp, CIN, COUT, CLAST)
    x = jax.random.normal(kx, (N, CIN, H, W), jnp.float32)

    packed = pack_params(params, CIN, COUT, CLAST)          # once per param set
    fwd = jax.jit(functools.partial(stm_renet_block_b, clast=CLAST))
    out = jax.block_until_ready(fwd(x, packed))
    assert out.shape == (N, CLAST, H // 2, W // 2), out.shape

    ref = jax.block_until_ready(reference_forward(x, params))
    np.testing.assert_allclose(np.asarray(out), np.asarray(ref),
                               rtol=2e-2, atol=2e-2)
    print("KERNEL_OK")
</pallas_src>

<mosaic_0001>
module attributes {stable_mosaic.version = 11 : i64} {
  func.func @_block_b_kernel(%arg0: i32, %arg1: memref<1x4x8x384xbf16, #tpu.memory_space<vmem>>, %arg2: memref<9x8x8xbf16, #tpu.memory_space<vmem>>, %arg3: memref<8x1xf32, #tpu.memory_space<vmem>>, %arg4: memref<1x256xf32, #tpu.memory_space<vmem>>, %arg5: memref<9x8x8xbf16, #tpu.memory_space<vmem>>, %arg6: memref<8x1xf32, #tpu.memory_space<vmem>>, %arg7: memref<1x120xf32, #tpu.memory_space<vmem>>, %arg8: memref<16x8xbf16, #tpu.memory_space<vmem>>, %arg9: memref<16x1xf32, #tpu.memory_space<vmem>>, %arg10: memref<1x16x64xf32, #tpu.memory_space<vmem>>, %arg11: memref<8x256xbf16, #tpu.memory_space<vmem>>) attributes {dimension_semantics = [#tpu.dimension_semantics<parallel>], iteration_bounds = array<i64: 2>, scalar_prefetch = 0 : i64, scratch_operands = 1 : i64, tpu.core_type = #tpu.core_type<tc>, window_params = [{transform_indices = @transform_0, window_bounds = array<i64: 1, 4, 8, 384>}, {pipeline_mode = #tpu.pipeline_mode<synchronous>, transform_indices = @transform_1, window_bounds = array<i64: 9, 8, 8>}, {pipeline_mode = #tpu.pipeline_mode<synchronous>, transform_indices = @transform_2, window_bounds = array<i64: 8, 1>}, {pipeline_mode = #tpu.pipeline_mode<synchronous>, transform_indices = @transform_3, window_bounds = array<i64: 1, 256>}, {pipeline_mode = #tpu.pipeline_mode<synchronous>, transform_indices = @transform_4, window_bounds = array<i64: 9, 8, 8>}, {pipeline_mode = #tpu.pipeline_mode<synchronous>, transform_indices = @transform_5, window_bounds = array<i64: 8, 1>}, {pipeline_mode = #tpu.pipeline_mode<synchronous>, transform_indices = @transform_6, window_bounds = array<i64: 1, 120>}, {pipeline_mode = #tpu.pipeline_mode<synchronous>, transform_indices = @transform_7, window_bounds = array<i64: 16, 8>}, {pipeline_mode = #tpu.pipeline_mode<synchronous>, transform_indices = @transform_8, window_bounds = array<i64: 16, 1>}, {transform_indices = @transform_9, window_bounds = array<i64: 1, 16, 64>}]} {
    %c0 = arith.constant 0 : index
    %c0_0 = arith.constant 0 : index
    %c0_1 = arith.constant 0 : index
    %0 = vector.load %arg2[%c0, %c0_0, %c0_1] : memref<9x8x8xbf16, #tpu.memory_space<vmem>>, vector<1x8x8xbf16>
    %1 = vector.shape_cast %0 : vector<1x8x8xbf16> to vector<8x8xbf16>
    %c1 = arith.constant 1 : index
    %c0_2 = arith.constant 0 : index
    %c0_3 = arith.constant 0 : index
    %2 = vector.load %arg2[%c1, %c0_2, %c0_3] : memref<9x8x8xbf16, #tpu.memory_space<vmem>>, vector<1x8x8xbf16>
    %3 = vector.shape_cast %2 : vector<1x8x8xbf16> to vector<8x8xbf16>
    %c2 = arith.constant 2 : index
    %c0_4 = arith.constant 0 : index
    %c0_5 = arith.constant 0 : index
    %4 = vector.load %arg2[%c2, %c0_4, %c0_5] : memref<9x8x8xbf16, #tpu.memory_space<vmem>>, vector<1x8x8xbf16>
    %5 = vector.shape_cast %4 : vector<1x8x8xbf16> to vector<8x8xbf16>
    %c3 = arith.constant 3 : index
    %c0_6 = arith.constant 0 : index
    %c0_7 = arith.constant 0 : index
    %6 = vector.load %arg2[%c3, %c0_6, %c0_7] : memref<9x8x8xbf16, #tpu.memory_space<vmem>>, vector<1x8x8xbf16>
    %7 = vector.shape_cast %6 : vector<1x8x8xbf16> to vector<8x8xbf16>
    %c4 = arith.constant 4 : index
    %c0_8 = arith.constant 0 : index
    %c0_9 = arith.constant 0 : index
    %8 = vector.load %arg2[%c4, %c0_8, %c0_9] : memref<9x8x8xbf16, #tpu.memory_space<vmem>>, vector<1x8x8xbf16>
    %9 = vector.shape_cast %8 : vector<1x8x8xbf16> to vector<8x8xbf16>
    %c5 = arith.constant 5 : index
    %c0_10 = arith.constant 0 : index
    %c0_11 = arith.constant 0 : index
    %10 = vector.load %arg2[%c5, %c0_10, %c0_11] : memref<9x8x8xbf16, #tpu.memory_space<vmem>>, vector<1x8x8xbf16>
    %11 = vector.shape_cast %10 : vector<1x8x8xbf16> to vector<8x8xbf16>
    %c6 = arith.constant 6 : index
    %c0_12 = arith.constant 0 : index
    %c0_13 = arith.constant 0 : index
    %12 = vector.load %arg2[%c6, %c0_12, %c0_13] : memref<9x8x8xbf16, #tpu.memory_space<vmem>>, vector<1x8x8xbf16>
    %13 = vector.shape_cast %12 : vector<1x8x8xbf16> to vector<8x8xbf16>
    %c7 = arith.constant 7 : index
    %c0_14 = arith.constant 0 : index
    %c0_15 = arith.constant 0 : index
    %14 = vector.load %arg2[%c7, %c0_14, %c0_15] : memref<9x8x8xbf16, #tpu.memory_space<vmem>>, vector<1x8x8xbf16>
    %15 = vector.shape_cast %14 : vector<1x8x8xbf16> to vector<8x8xbf16>
    %c8 = arith.constant 8 : index
    %c0_16 = arith.constant 0 : index
    %c0_17 = arith.constant 0 : index
    %16 = vector.load %arg2[%c8, %c0_16, %c0_17] : memref<9x8x8xbf16, #tpu.memory_space<vmem>>, vector<1x8x8xbf16>
    %17 = vector.shape_cast %16 : vector<1x8x8xbf16> to vector<8x8xbf16>
    %c0_18 = arith.constant 0 : index
    %c0_19 = arith.constant 0 : index
    %c0_20 = arith.constant 0 : index
    %18 = vector.load %arg5[%c0_18, %c0_19, %c0_20] : memref<9x8x8xbf16, #tpu.memory_space<vmem>>, vector<1x8x8xbf16>
    %19 = vector.shape_cast %18 : vector<1x8x8xbf16> to vector<8x8xbf16>
    %c1_21 = arith.constant 1 : index
    %c0_22 = arith.constant 0 : index
    %c0_23 = arith.constant 0 : index
    %20 = vector.load %arg5[%c1_21, %c0_22, %c0_23] : memref<9x8x8xbf16, #tpu.memory_space<vmem>>, vector<1x8x8xbf16>
    %21 = vector.shape_cast %20 : vector<1x8x8xbf16> to vector<8x8xbf16>
    %c2_24 = arith.constant 2 : index
    %c0_25 = arith.constant 0 : index
    %c0_26 = arith.constant 0 : index
    %22 = vector.load %arg5[%c2_24, %c0_25, %c0_26] : memref<9x8x8xbf16, #tpu.memory_space<vmem>>, vector<1x8x8xbf16>
    %23 = vector.shape_cast %22 : vector<1x8x8xbf16> to vector<8x8xbf16>
    %c3_27 = arith.constant 3 : index
    %c0_28 = arith.constant 0 : index
    %c0_29 = arith.constant 0 : index
    %24 = vector.load %arg5[%c3_27, %c0_28, %c0_29] : memref<9x8x8xbf16, #tpu.memory_space<vmem>>, vector<1x8x8xbf16>
    %25 = vector.shape_cast %24 : vector<1x8x8xbf16> to vector<8x8xbf16>
    %c4_30 = arith.constant 4 : index
    %c0_31 = arith.constant 0 : index
    %c0_32 = arith.constant 0 : index
    %26 = vector.load %arg5[%c4_30, %c0_31, %c0_32] : memref<9x8x8xbf16, #tpu.memory_space<vmem>>, vector<1x8x8xbf16>
    %27 = vector.shape_cast %26 : vector<1x8x8xbf16> to vector<8x8xbf16>
    %c5_33 = arith.constant 5 : index
    %c0_34 = arith.constant 0 : index
    %c0_35 = arith.constant 0 : index
    %28 = vector.load %arg5[%c5_33, %c0_34, %c0_35] : memref<9x8x8xbf16, #tpu.memory_space<vmem>>, vector<1x8x8xbf16>
    %29 = vector.shape_cast %28 : vector<1x8x8xbf16> to vector<8x8xbf16>
    %c6_36 = arith.constant 6 : index
    %c0_37 = arith.constant 0 : index
    %c0_38 = arith.constant 0 : index
    %30 = vector.load %arg5[%c6_36, %c0_37, %c0_38] : memref<9x8x8xbf16, #tpu.memory_space<vmem>>, vector<1x8x8xbf16>
    %31 = vector.shape_cast %30 : vector<1x8x8xbf16> to vector<8x8xbf16>
    %c7_39 = arith.constant 7 : index
    %c0_40 = arith.constant 0 : index
    %c0_41 = arith.constant 0 : index
    %32 = vector.load %arg5[%c7_39, %c0_40, %c0_41] : memref<9x8x8xbf16, #tpu.memory_space<vmem>>, vector<1x8x8xbf16>
    %33 = vector.shape_cast %32 : vector<1x8x8xbf16> to vector<8x8xbf16>
    %c8_42 = arith.constant 8 : index
    %c0_43 = arith.constant 0 : index
    %c0_44 = arith.constant 0 : index
    %34 = vector.load %arg5[%c8_42, %c0_43, %c0_44] : memref<9x8x8xbf16, #tpu.memory_space<vmem>>, vector<1x8x8xbf16>
    %35 = vector.shape_cast %34 : vector<1x8x8xbf16> to vector<8x8xbf16>
    %c0_45 = arith.constant 0 : index
    %c0_46 = arith.constant 0 : index
    %36 = vector.load %arg8[%c0_45, %c0_46] : memref<16x8xbf16, #tpu.memory_space<vmem>>, vector<16x8xbf16>
    %c0_47 = arith.constant 0 : index
    %c0_48 = arith.constant 0 : index
    %37 = vector.load %arg3[%c0_47, %c0_48] : memref<8x1xf32, #tpu.memory_space<vmem>>, vector<8x1xf32>
    %c0_49 = arith.constant 0 : index
    %c0_50 = arith.constant 0 : index
    %38 = vector.load %arg6[%c0_49, %c0_50] : memref<8x1xf32, #tpu.memory_space<vmem>>, vector<8x1xf32>
    %c0_51 = arith.constant 0 : index
    %c0_52 = arith.constant 0 : index
    %39 = vector.load %arg9[%c0_51, %c0_52] : memref<16x1xf32, #tpu.memory_space<vmem>>, vector<16x1xf32>
    %c0_53 = arith.constant 0 : index
    %c0_54 = arith.constant 0 : index
    %40 = vector.load %arg4[%c0_53, %c0_54] : memref<1x256xf32, #tpu.memory_space<vmem>>, vector<1x256xf32>
    %c0_55 = arith.constant 0 : index
    %c0_56 = arith.constant 0 : index
    %41 = vector.load %arg7[%c0_55, %c0_56] : memref<1x120xf32, #tpu.memory_space<vmem>>, vector<1x120xf32>
    %cst = arith.constant 0.000000e+00 : f32
    %42 = vector.broadcast %cst : f32 to vector<8x256xf32>
    %cst_57 = arith.constant 0.000000e+00 : f32
    %43 = vector.broadcast %cst_57 : f32 to vector<8x256xf32>
    %c0_58 = arith.constant 0 : index
    %c0_59 = arith.constant 0 : index
    %c0_60 = arith.constant 0 : index
    %c0_61 = arith.constant 0 : index
    %44 = vector.load %arg1[%c0_58, %c0_59, %c0_60, %c0_61] : memref<1x4x8x384xbf16, #tpu.memory_space<vmem>>, vector<1x1x8x256xbf16>
    %45 = vector.shape_cast %44 : vector<1x1x8x256xbf16> to vector<8x256xbf16>
    %cst_62 = arith.constant dense<0.000000e+00> : vector<8x256xf32>
    %46 = tpu.matmul %1, %45, %cst_62 {dimension_numbers = #tpu.dot_dimension_numbers<[1], [0], [0], [1], [0, 0, 1, 1], [], []>} : vector<8x8xbf16>, vector<8x256xbf16>, vector<8x256xf32> -> vector<8x256xf32>
    %47 = arith.addf %43, %46 : vector<8x256xf32>
    %c0_63 = arith.constant 0 : index
    %c0_64 = arith.constant 0 : index
    %c0_65 = arith.constant 0 : index
    %c1_66 = arith.constant 1 : index
    %48 = vector.load %arg1[%c0_63, %c0_64, %c0_65, %c1_66] : memref<1x4x8x384xbf16, #tpu.memory_space<vmem>>, vector<1x1x8x256xbf16>
    %49 = vector.shape_cast %48 : vector<1x1x8x256xbf16> to vector<8x256xbf16>
    %cst_67 = arith.constant dense<0.000000e+00> : vector<8x256xf32>
    %50 = tpu.matmul %3, %49, %cst_67 {dimension_numbers = #tpu.dot_dimension_numbers<[1], [0], [0], [1], [0, 0, 1, 1], [], []>} : vector<8x8xbf16>, vector<8x256xbf16>, vector<8x256xf32> -> vector<8x256xf32>
    %51 = arith.addf %47, %50 : vector<8x256xf32>
    %c0_68 = arith.constant 0 : index
    %c0_69 = arith.constant 0 : index
    %c0_70 = arith.constant 0 : index
    %c2_71 = arith.constant 2 : index
    %52 = vector.load %arg1[%c0_68, %c0_69, %c0_70, %c2_71] : memref<1x4x8x384xbf16, #tpu.memory_space<vmem>>, vector<1x1x8x256xbf16>
    %53 = vector.shape_cast %52 : vector<1x1x8x256xbf16> to vector<8x256xbf16>
    %cst_72 = arith.constant dense<0.000000e+00> : vector<8x256xf32>
    %54 = tpu.matmul %5, %53, %cst_72 {dimension_numbers = #tpu.dot_dimension_numbers<[1], [0], [0], [1], [0, 0, 1, 1], [], []>} : vector<8x8xbf16>, vector<8x256xbf16>, vector<8x256xf32> -> vector<8x256xf32>
    %55 = arith.addf %51, %54 : vector<8x256xf32>
    %c0_73 = arith.constant 0 : index
    %c0_74 = arith.constant 0 : index
    %c0_75 = arith.constant 0 : index
    %c12 = arith.constant 12 : index
    %56 = vector.load %arg1[%c0_73, %c0_74, %c0_75, %c12] : memref<1x4x8x384xbf16, #tpu.memory_space<vmem>>, vector<1x1x8x256xbf16>
    %57 = vector.shape_cast %56 : vector<1x1x8x256xbf16> to vector<8x256xbf16>
    %cst_76 = arith.constant dense<0.000000e+00> : vector<8x256xf32>
    %58 = tpu.matmul %7, %57, %cst_76 {dimension_numbers = #tpu.dot_dimension_numbers<[1], [0], [0], [1], [0, 0, 1, 1], [], []>} : vector<8x8xbf16>, vector<8x256xbf16>, vector<8x256xf32> -> vector<8x256xf32>
    %59 = arith.addf %55, %58 : vector<8x256xf32>
    %c0_77 = arith.constant 0 : index
    %c0_78 = arith.constant 0 : index
    %c0_79 = arith.constant 0 : index
    %c13 = arith.constant 13 : index
    %60 = vector.load %arg1[%c0_77, %c0_78, %c0_79, %c13] : memref<1x4x8x384xbf16, #tpu.memory_space<vmem>>, vector<1x1x8x256xbf16>
    %61 = vector.shape_cast %60 : vector<1x1x8x256xbf16> to vector<8x256xbf16>
    %cst_80 = arith.constant dense<0.000000e+00> : vector<8x256xf32>
    %62 = tpu.matmul %9, %61, %cst_80 {dimension_numbers = #tpu.dot_dimension_numbers<[1], [0], [0], [1], [0, 0, 1, 1], [], []>} : vector<8x8xbf16>, vector<8x256xbf16>, vector<8x256xf32> -> vector<8x256xf32>
    %63 = arith.addf %59, %62 : vector<8x256xf32>
    %c0_81 = arith.constant 0 : index
    %c0_82 = arith.constant 0 : index
    %c0_83 = arith.constant 0 : index
    %c14 = arith.constant 14 : index
    %64 = vector.load %arg1[%c0_81, %c0_82, %c0_83, %c14] : memref<1x4x8x384xbf16, #tpu.memory_space<vmem>>, vector<1x1x8x256xbf16>
    %65 = vector.shape_cast %64 : vector<1x1x8x256xbf16> to vector<8x256xbf16>
    %cst_84 = arith.constant dense<0.000000e+00> : vector<8x256xf32>
    %66 = tpu.matmul %11, %65, %cst_84 {dimension_numbers = #tpu.dot_dimension_numbers<[1], [0], [0], [1], [0, 0, 1, 1], [], []>} : vector<8x8xbf16>, vector<8x256xbf16>, vector<8x256xf32> -> vector<8x256xf32>
    %67 = arith.addf %63, %66 : vector<8x256xf32>
    %c0_85 = arith.constant 0 : index
    %c0_86 = arith.constant 0 : index
    %c0_87 = arith.constant 0 : index
    %c24 = arith.constant 24 : index
    %68 = vector.load %arg1[%c0_85, %c0_86, %c0_87, %c24] : memref<1x4x8x384xbf16, #tpu.memory_space<vmem>>, vector<1x1x8x256xbf16>
    %69 = vector.shape_cast %68 : vector<1x1x8x256xbf16> to vector<8x256xbf16>
    %cst_88 = arith.constant dense<0.000000e+00> : vector<8x256xf32>
    %70 = tpu.matmul %13, %69, %cst_88 {dimension_numbers = #tpu.dot_dimension_numbers<[1], [0], [0], [1], [0, 0, 1, 1], [], []>} : vector<8x8xbf16>, vector<8x256xbf16>, vector<8x256xf32> -> vector<8x256xf32>
    %71 = arith.addf %67, %70 : vector<8x256xf32>
    %c0_89 = arith.constant 0 : index
    %c0_90 = arith.constant 0 : index
    %c0_91 = arith.constant 0 : index
    %c25 = arith.constant 25 : index
    %72 = vector.load %arg1[%c0_89, %c0_90, %c0_91, %c25] : memref<1x4x8x384xbf16, #tpu.memory_space<vmem>>, vector<1x1x8x256xbf16>
    %73 = vector.shape_cast %72 : vector<1x1x8x256xbf16> to vector<8x256xbf16>
    %cst_92 = arith.constant dense<0.000000e+00> : vector<8x256xf32>
    %74 = tpu.matmul %15, %73, %cst_92 {dimension_numbers = #tpu.dot_dimension_numbers<[1], [0], [0], [1], [0, 0, 1, 1], [], []>} : vector<8x8xbf16>, vector<8x256xbf16>, vector<8x256xf32> -> vector<8x256xf32>
    %75 = arith.addf %71, %74 : vector<8x256xf32>
    %c0_93 = arith.constant 0 : index
    %c0_94 = arith.constant 0 : index
    %c0_95 = arith.constant 0 : index
    %c26 = arith.constant 26 : index
    %76 = vector.load %arg1[%c0_93, %c0_94, %c0_95, %c26] : memref<1x4x8x384xbf16, #tpu.memory_space<vmem>>, vector<1x1x8x256xbf16>
    %77 = vector.shape_cast %76 : vector<1x1x8x256xbf16> to vector<8x256xbf16>
    %cst_96 = arith.constant dense<0.000000e+00> : vector<8x256xf32>
    %78 = tpu.matmul %17, %77, %cst_96 {dimension_numbers = #tpu.dot_dimension_numbers<[1], [0], [0], [1], [0, 0, 1, 1], [], []>} : vector<8x8xbf16>, vector<8x256xbf16>, vector<8x256xf32> -> vector<8x256xf32>
    %79 = arith.addf %75, %78 : vector<8x256xf32>
    %80 = vector.broadcast %37 : vector<8x1xf32> to vector<8x256xf32>
    %81 = arith.addf %79, %80 : vector<8x256xf32>
    %cst_97 = arith.constant 0.000000e+00 : f32
    %82 = vector.broadcast %cst_97 : f32 to vector<8x256xf32>
    %83 = arith.maximumf %81, %82 : vector<8x256xf32>
    %84 = arith.addf %42, %83 : vector<8x256xf32>
    %cst_98 = arith.constant 0.000000e+00 : f32
    %85 = vector.broadcast %cst_98 : f32 to vector<8x256xf32>
    %c0_99 = arith.constant 0 : index
    %c1_100 = arith.constant 1 : index
    %c0_101 = arith.constant 0 : index
    %c0_102 = arith.constant 0 : index
    %86 = vector.load %arg1[%c0_99, %c1_100, %c0_101, %c0_102] : memref<1x4x8x384xbf16, #tpu.memory_space<vmem>>, vector<1x1x8x256xbf16>
    %87 = vector.shape_cast %86 : vector<1x1x8x256xbf16> to vector<8x256xbf16>
    %cst_103 = arith.constant dense<0.000000e+00> : vector<8x256xf32>
    %88 = tpu.matmul %1, %87, %cst_103 {dimension_numbers = #tpu.dot_dimension_numbers<[1], [0], [0], [1], [0, 0, 1, 1], [], []>} : vector<8x8xbf16>, vector<8x256xbf16>, vector<8x256xf32> -> vector<8x256xf32>
    %89 = arith.addf %85, %88 : vector<8x256xf32>
    %c0_104 = arith.constant 0 : index
    %c1_105 = arith.constant 1 : index
    %c0_106 = arith.constant 0 : index
    %c1_107 = arith.constant 1 : index
    %90 = vector.load %arg1[%c0_104, %c1_105, %c0_106, %c1_107] : memref<1x4x8x384xbf16, #tpu.memory_space<vmem>>, vector<1x1x8x256xbf16>
    %91 = vector.shape_cast %90 : vector<1x1x8x256xbf16> to vector<8x256xbf16>
    %cst_108 = arith.constant dense<0.000000e+00> : vector<8x256xf32>
    %92 = tpu.matmul %3, %91, %cst_108 {dimension_numbers = #tpu.dot_dimension_numbers<[1], [0], [0], [1], [0, 0, 1, 1], [], []>} : vector<8x8xbf16>, vector<8x256xbf16>, vector<8x256xf32> -> vector<8x256xf32>
    %93 = arith.addf %89, %92 : vector<8x256xf32>
    %c0_109 = arith.constant 0 : index
    %c1_110 = arith.constant 1 : index
    %c0_111 = arith.constant 0 : index
    %c2_112 = arith.constant 2 : index
    %94 = vector.load %arg1[%c0_109, %c1_110, %c0_111, %c2_112] : memref<1x4x8x384xbf16, #tpu.memory_space<vmem>>, vector<1x1x8x256xbf16>
    %95 = vector.shape_cast %94 : vector<1x1x8x256xbf16> to vector<8x256xbf16>
    %cst_113 = arith.constant dense<0.000000e+00> : vector<8x256xf32>
    %96 = tpu.matmul %5, %95, %cst_113 {dimension_numbers = #tpu.dot_dimension_numbers<[1], [0], [0], [1], [0, 0, 1, 1], [], []>} : vector<8x8xbf16>, vector<8x256xbf16>, vector<8x256xf32> -> vector<8x256xf32>
    %97 = arith.addf %93, %96 : vector<8x256xf32>
    %c0_114 = arith.constant 0 : index
    %c1_115 = arith.constant 1 : index
    %c0_116 = arith.constant 0 : index
    %c12_117 = arith.constant 12 : index
    %98 = vector.load %arg1[%c0_114, %c1_115, %c0_116, %c12_117] : memref<1x4x8x384xbf16, #tpu.memory_space<vmem>>, vector<1x1x8x256xbf16>
    %99 = vector.shape_cast %98 : vector<1x1x8x256xbf16> to vector<8x256xbf16>
    %cst_118 = arith.constant dense<0.000000e+00> : vector<8x256xf32>
    %100 = tpu.matmul %7, %99, %cst_118 {dimension_numbers = #tpu.dot_dimension_numbers<[1], [0], [0], [1], [0, 0, 1, 1], [], []>} : vector<8x8xbf16>, vector<8x256xbf16>, vector<8x256xf32> -> vector<8x256xf32>
    %101 = arith.addf %97, %100 : vector<8x256xf32>
    %c0_119 = arith.constant 0 : index
    %c1_120 = arith.constant 1 : index
    %c0_121 = arith.constant 0 : index
    %c13_122 = arith.constant 13 : index
    %102 = vector.load %arg1[%c0_119, %c1_120, %c0_121, %c13_122] : memref<1x4x8x384xbf16, #tpu.memory_space<vmem>>, vector<1x1x8x256xbf16>
    %103 = vector.shape_cast %102 : vector<1x1x8x256xbf16> to vector<8x256xbf16>
    %cst_123 = arith.constant dense<0.000000e+00> : vector<8x256xf32>
    %104 = tpu.matmul %9, %103, %cst_123 {dimension_numbers = #tpu.dot_dimension_numbers<[1], [0], [0], [1], [0, 0, 1, 1], [], []>} : vector<8x8xbf16>, vector<8x256xbf16>, vector<8x256xf32> -> vector<8x256xf32>
    %105 = arith.addf %101, %104 : vector<8x256xf32>
    %c0_124 = arith.constant 0 : index
    %c1_125 = arith.constant 1 : index
    %c0_126 = arith.constant 0 : index
    %c14_127 = arith.constant 14 : index
    %106 = vector.load %arg1[%c0_124, %c1_125, %c0_126, %c14_127] : memref<1x4x8x384xbf16, #tpu.memory_space<vmem>>, vector<1x1x8x256xbf16>
    %107 = vector.shape_cast %106 : vector<1x1x8x256xbf16> to vector<8x256xbf16>
    %cst_128 = arith.constant dense<0.000000e+00> : vector<8x256xf32>
    %108 = tpu.matmul %11, %107, %cst_128 {dimension_numbers = #tpu.dot_dimension_numbers<[1], [0], [0], [1], [0, 0, 1, 1], [], []>} : vector<8x8xbf16>, vector<8x256xbf16>, vector<8x256xf32> -> vector<8x256xf32>
    %109 = arith.addf %105, %108 : vector<8x256xf32>
    %c0_129 = arith.constant 0 : index
    %c1_130 = arith.constant 1 : index
    %c0_131 = arith.constant 0 : index
    %c24_132 = arith.constant 24 : index
    %110 = vector.load %arg1[%c0_129, %c1_130, %c0_131, %c24_132] : memref<1x4x8x384xbf16, #tpu.memory_space<vmem>>, vector<1x1x8x256xbf16>
    %111 = vector.shape_cast %110 : vector<1x1x8x256xbf16> to vector<8x256xbf16>
    %cst_133 = arith.constant dense<0.000000e+00> : vector<8x256xf32>
    %112 = tpu.matmul %13, %111, %cst_133 {dimension_numbers = #tpu.dot_dimension_numbers<[1], [0], [0], [1], [0, 0, 1, 1], [], []>} : vector<8x8xbf16>, vector<8x256xbf16>, vector<8x256xf32> -> vector<8x256xf32>
    %113 = arith.addf %109, %112 : vector<8x256xf32>
    %c0_134 = arith.constant 0 : index
    %c1_135 = arith.constant 1 : index
    %c0_136 = arith.constant 0 : index
    %c25_137 = arith.constant 25 : index
    %114 = vector.load %arg1[%c0_134, %c1_135, %c0_136, %c25_137] : memref<1x4x8x384xbf16, #tpu.memory_space<vmem>>, vector<1x1x8x256xbf16>
    %115 = vector.shape_cast %114 : vector<1x1x8x256xbf16> to vector<8x256xbf16>
    %cst_138 = arith.constant dense<0.000000e+00> : vector<8x256xf32>
    %116 = tpu.matmul %15, %115, %cst_138 {dimension_numbers = #tpu.dot_dimension_numbers<[1], [0], [0], [1], [0, 0, 1, 1], [], []>} : vector<8x8xbf16>, vector<8x256xbf16>, vector<8x256xf32> -> vector<8x256xf32>
    %117 = arith.addf %113, %116 : vector<8x256xf32>
    %c0_139 = arith.constant 0 : index
    %c1_140 = arith.constant 1 : index
    %c0_141 = arith.constant 0 : index
    %c26_142 = arith.constant 26 : index
    %118 = vector.load %arg1[%c0_139, %c1_140, %c0_141, %c26_142] : memref<1x4x8x384xbf16, #tpu.memory_space<vmem>>, vector<1x1x8x256xbf16>
    %119 = vector.shape_cast %118 : vector<1x1x8x256xbf16> to vector<8x256xbf16>
    %cst_143 = arith.constant dense<0.000000e+00> : vector<8x256xf32>
    %120 = tpu.matmul %17, %119, %cst_143 {dimension_numbers = #tpu.dot_dimension_numbers<[1], [0], [0], [1], [0, 0, 1, 1], [], []>} : vector<8x8xbf16>, vector<8x256xbf16>, vector<8x256xf32> -> vector<8x256xf32>
    %121 = arith.addf %117, %120 : vector<8x256xf32>
    %122 = vector.broadcast %37 : vector<8x1xf32> to vector<8x256xf32>
    %123 = arith.addf %121, %122 : vector<8x256xf32>
    %cst_144 = arith.constant 0.000000e+00 : f32
    %124 = vector.broadcast %cst_144 : f32 to vector<8x256xf32>
    %125 = arith.maximumf %123, %124 : vector<8x256xf32>
    %126 = arith.addf %84, %125 : vector<8x256xf32>
    %cst_145 = arith.constant 0.000000e+00 : f32
    %127 = vector.broadcast %cst_145 : f32 to vector<8x256xf32>
    %c0_146 = arith.constant 0 : index
    %c2_147 = arith.constant 2 : index
    %c0_148 = arith.constant 0 : index
    %c0_149 = arith.constant 0 : index
    %128 = vector.load %arg1[%c0_146, %c2_147, %c0_148, %c0_149] : memref<1x4x8x384xbf16, #tpu.memory_space<vmem>>, vector<1x1x8x256xbf16>
    %129 = vector.shape_cast %128 : vector<1x1x8x256xbf16> to vector<8x256xbf16>
    %cst_150 = arith.constant dense<0.000000e+00> : vector<8x256xf32>
    %130 = tpu.matmul %1, %129, %cst_150 {dimension_numbers = #tpu.dot_dimension_numbers<[1], [0], [0], [1], [0, 0, 1, 1], [], []>} : vector<8x8xbf16>, vector<8x256xbf16>, vector<8x256xf32> -> vector<8x256xf32>
    %131 = arith.addf %127, %130 : vector<8x256xf32>
    %c0_151 = arith.constant 0 : index
    %c2_152 = arith.constant 2 : index
    %c0_153 = arith.constant 0 : index
    %c1_154 = arith.constant 1 : index
    %132 = vector.load %arg1[%c0_151, %c2_152, %c0_153, %c1_154] : memref<1x4x8x384xbf16, #tpu.memory_space<vmem>>, vector<1x1x8x256xbf16>
    %133 = vector.shape_cast %132 : vector<1x1x8x256xbf16> to vector<8x256xbf16>
    %cst_155 = arith.constant dense<0.000000e+00> : vector<8x256xf32>
    %134 = tpu.matmul %3, %133, %cst_155 {dimension_numbers = #tpu.dot_dimension_numbers<[1], [0], [0], [1], [0, 0, 1, 1], [], []>} : vector<8x8xbf16>, vector<8x256xbf16>, vector<8x256xf32> -> vector<8x256xf32>
    %135 = arith.addf %131, %134 : vector<8x256xf32>
    %c0_156 = arith.constant 0 : index
    %c2_157 = arith.constant 2 : index
    %c0_158 = arith.constant 0 : index
    %c2_159 = arith.constant 2 : index
    %136 = vector.load %arg1[%c0_156, %c2_157, %c0_158, %c2_159] : memref<1x4x8x384xbf16, #tpu.memory_space<vmem>>, vector<1x1x8x256xbf16>
    %137 = vector.shape_cast %136 : vector<1x1x8x256xbf16> to vector<8x256xbf16>
    %cst_160 = arith.constant dense<0.000000e+00> : vector<8x256xf32>
    %138 = tpu.matmul %5, %137, %cst_160 {dimension_numbers = #tpu.dot_dimension_numbers<[1], [0], [0], [1], [0, 0, 1, 1], [], []>} : vector<8x8xbf16>, vector<8x256xbf16>, vector<8x256xf32> -> vector<8x256xf32>
    %139 = arith.addf %135, %138 : vector<8x256xf32>
    %c0_161 = arith.constant 0 : index
    %c2_162 = arith.constant 2 : index
    %c0_163 = arith.constant 0 : index
    %c12_164 = arith.constant 12 : index
    %140 = vector.load %arg1[%c0_161, %c2_162, %c0_163, %c12_164] : memref<1x4x8x384xbf16, #tpu.memory_space<vmem>>, vector<1x1x8x256xbf16>
    %141 = vector.shape_cast %140 : vector<1x1x8x256xbf16> to vector<8x256xbf16>
    %cst_165 = arith.constant dense<0.000000e+00> : vector<8x256xf32>
    %142 = tpu.matmul %7, %141, %cst_165 {dimension_numbers = #tpu.dot_dimension_numbers<[1], [0], [0], [1], [0, 0, 1, 1], [], []>} : vector<8x8xbf16>, vector<8x256xbf16>, vector<8x256xf32> -> vector<8x256xf32>
    %143 = arith.addf %139, %142 : vector<8x256xf32>
    %c0_166 = arith.constant 0 : index
    %c2_167 = arith.constant 2 : index
    %c0_168 = arith.constant 0 : index
    %c13_169 = arith.constant 13 : index
    %144 = vector.load %arg1[%c0_166, %c2_167, %c0_168, %c13_169] : memref<1x4x8x384xbf16, #tpu.memory_space<vmem>>, vector<1x1x8x256xbf16>
    %145 = vector.shape_cast %144 : vector<1x1x8x256xbf16> to vector<8x256xbf16>
    %cst_170 = arith.constant dense<0.000000e+00> : vector<8x256xf32>
    %146 = tpu.matmul %9, %145, %cst_170 {dimension_numbers = #tpu.dot_dimension_numbers<[1], [0], [0], [1], [0, 0, 1, 1], [], []>} : vector<8x8xbf16>, vector<8x256xbf16>, vector<8x256xf32> -> vector<8x256xf32>
    %147 = arith.addf %143, %146 : vector<8x256xf32>
    %c0_171 = arith.constant 0 : index
    %c2_172 = arith.constant 2 : index
    %c0_173 = arith.constant 0 : index
    %c14_174 = arith.constant 14 : index
    %148 = vector.load %arg1[%c0_171, %c2_172, %c0_173, %c14_174] : memref<1x4x8x384xbf16, #tpu.memory_space<vmem>>, vector<1x1x8x256xbf16>
    %149 = vector.shape_cast %148 : vector<1x1x8x256xbf16> to vector<8x256xbf16>
    %cst_175 = arith.constant dense<0.000000e+00> : vector<8x256xf32>
    %150 = tpu.matmul %11, %149, %cst_175 {dimension_numbers = #tpu.dot_dimension_numbers<[1], [0], [0], [1], [0, 0, 1, 1], [], []>} : vector<8x8xbf16>, vector<8x256xbf16>, vector<8x256xf32> -> vector<8x256xf32>
    %151 = arith.addf %147, %150 : vector<8x256xf32>
    %c0_176 = arith.constant 0 : index
    %c2_177 = arith.constant 2 : index
    %c0_178 = arith.constant 0 : index
    %c24_179 = arith.constant 24 : index
    %152 = vector.load %arg1[%c0_176, %c2_177, %c0_178, %c24_179] : memref<1x4x8x384xbf16, #tpu.memory_space<vmem>>, vector<1x1x8x256xbf16>
    %153 = vector.shape_cast %152 : vector<1x1x8x256xbf16> to vector<8x256xbf16>
    %cst_180 = arith.constant dense<0.000000e+00> : vector<8x256xf32>
    %154 = tpu.matmul %13, %153, %cst_180 {dimension_numbers = #tpu.dot_dimension_numbers<[1], [0], [0], [1], [0, 0, 1, 1], [], []>} : vector<8x8xbf16>, vector<8x256xbf16>, vector<8x256xf32> -> vector<8x256xf32>
    %155 = arith.addf %151, %154 : vector<8x256xf32>
    %c0_181 = arith.constant 0 : index
    %c2_182 = arith.constant 2 : index
    %c0_183 = arith.constant 0 : index
    %c25_184 = arith.constant 25 : index
    %156 = vector.load %arg1[%c0_181, %c2_182, %c0_183, %c25_184] : memref<1x4x8x384xbf16, #tpu.memory_space<vmem>>, vector<1x1x8x256xbf16>
    %157 = vector.shape_cast %156 : vector<1x1x8x256xbf16> to vector<8x256xbf16>
    %cst_185 = arith.constant dense<0.000000e+00> : vector<8x256xf32>
    %158 = tpu.matmul %15, %157, %cst_185 {dimension_numbers = #tpu.dot_dimension_numbers<[1], [0], [0], [1], [0, 0, 1, 1], [], []>} : vector<8x8xbf16>, vector<8x256xbf16>, vector<8x256xf32> -> vector<8x256xf32>
    %159 = arith.addf %155, %158 : vector<8x256xf32>
    %c0_186 = arith.constant 0 : index
    %c2_187 = arith.constant 2 : index
    %c0_188 = arith.constant 0 : index
    %c26_189 = arith.constant 26 : index
    %160 = vector.load %arg1[%c0_186, %c2_187, %c0_188, %c26_189] : memref<1x4x8x384xbf16, #tpu.memory_space<vmem>>, vector<1x1x8x256xbf16>
    %161 = vector.shape_cast %160 : vector<1x1x8x256xbf16> to vector<8x256xbf16>
    %cst_190 = arith.constant dense<0.000000e+00> : vector<8x256xf32>
    %162 = tpu.matmul %17, %161, %cst_190 {dimension_numbers = #tpu.dot_dimension_numbers<[1], [0], [0], [1], [0, 0, 1, 1], [], []>} : vector<8x8xbf16>, vector<8x256xbf16>, vector<8x256xf32> -> vector<8x256xf32>
    %163 = arith.addf %159, %162 : vector<8x256xf32>
    %164 = vector.broadcast %37 : vector<8x1xf32> to vector<8x256xf32>
    %165 = arith.addf %163, %164 : vector<8x256xf32>
    %cst_191 = arith.constant 0.000000e+00 : f32
    %166 = vector.broadcast %cst_191 : f32 to vector<8x256xf32>
    %167 = arith.maximumf %165, %166 : vector<8x256xf32>
    %168 = arith.addf %126, %167 : vector<8x256xf32>
    %cst_192 = arith.constant 0.000000e+00 : f32
    %169 = vector.broadcast %cst_192 : f32 to vector<8x256xf32>
    %c0_193 = arith.constant 0 : index
    %c3_194 = arith.constant 3 : index
    %c0_195 = arith.constant 0 : index
    %c0_196 = arith.constant 0 : index
    %170 = vector.load %arg1[%c0_193, %c3_194, %c0_195, %c0_196] : memref<1x4x8x384xbf16, #tpu.memory_space<vmem>>, vector<1x1x8x256xbf16>
    %171 = vector.shape_cast %170 : vector<1x1x8x256xbf16> to vector<8x256xbf16>
    %cst_197 = arith.constant dense<0.000000e+00> : vector<8x256xf32>
    %172 = tpu.matmul %1, %171, %cst_197 {dimension_numbers = #tpu.dot_dimension_numbers<[1], [0], [0], [1], [0, 0, 1, 1], [], []>} : vector<8x8xbf16>, vector<8x256xbf16>, vector<8x256xf32> -> vector<8x256xf32>
    %173 = arith.addf %169, %172 : vector<8x256xf32>
    %c0_198 = arith.constant 0 : index
    %c3_199 = arith.constant 3 : index
    %c0_200 = arith.constant 0 : index
    %c1_201 = arith.constant 1 : index
    %174 = vector.load %arg1[%c0_198, %c3_199, %c0_200, %c1_201] : memref<1x4x8x384xbf16, #tpu.memory_space<vmem>>, vector<1x1x8x256xbf16>
    %175 = vector.shape_cast %174 : vector<1x1x8x256xbf16> to vector<8x256xbf16>
    %cst_202 = arith.constant dense<0.000000e+00> : vector<8x256xf32>
    %176 = tpu.matmul %3, %175, %cst_202 {dimension_numbers = #tpu.dot_dimension_numbers<[1], [0], [0], [1], [0, 0, 1, 1], [], []>} : vector<8x8xbf16>, vector<8x256xbf16>, vector<8x256xf32> -> vector<8x256xf32>
    %177 = arith.addf %173, %176 : vector<8x256xf32>
    %c0_203 = arith.constant 0 : index
    %c3_204 = arith.constant 3 : index
    %c0_205 = arith.constant 0 : index
    %c2_206 = arith.constant 2 : index
    %178 = vector.load %arg1[%c0_203, %c3_204, %c0_205, %c2_206] : memref<1x4x8x384xbf16, #tpu.memory_space<vmem>>, vector<1x1x8x256xbf16>
    %179 = vector.shape_cast %178 : vector<1x1x8x256xbf16> to vector<8x256xbf16>
    %cst_207 = arith.constant dense<0.000000e+00> : vector<8x256xf32>
    %180 = tpu.matmul %5, %179, %cst_207 {dimension_numbers = #tpu.dot_dimension_numbers<[1], [0], [0], [1], [0, 0, 1, 1], [], []>} : vector<8x8xbf16>, vector<8x256xbf16>, vector<8x256xf32> -> vector<8x256xf32>
    %181 = arith.addf %177, %180 : vector<8x256xf32>
    %c0_208 = arith.constant 0 : index
    %c3_209 = arith.constant 3 : index
    %c0_210 = arith.constant 0 : index
    %c12_211 = arith.constant 12 : index
    %182 = vector.load %arg1[%c0_208, %c3_209, %c0_210, %c12_211] : memref<1x4x8x384xbf16, #tpu.memory_space<vmem>>, vector<1x1x8x256xbf16>
    %183 = vector.shape_cast %182 : vector<1x1x8x256xbf16> to vector<8x256xbf16>
    %cst_212 = arith.constant dense<0.000000e+00> : vector<8x256xf32>
    %184 = tpu.matmul %7, %183, %cst_212 {dimension_numbers = #tpu.dot_dimension_numbers<[1], [0], [0], [1], [0, 0, 1, 1], [], []>} : vector<8x8xbf16>, vector<8x256xbf16>, vector<8x256xf32> -> vector<8x256xf32>
    %185 = arith.addf %181, %184 : vector<8x256xf32>
    %c0_213 = arith.constant 0 : index
    %c3_214 = arith.constant 3 : index
    %c0_215 = arith.constant 0 : index
    %c13_216 = arith.constant 13 : index
    %186 = vector.load %arg1[%c0_213, %c3_214, %c0_215, %c13_216] : memref<1x4x8x384xbf16, #tpu.memory_space<vmem>>, vector<1x1x8x256xbf16>
    %187 = vector.shape_cast %186 : vector<1x1x8x256xbf16> to vector<8x256xbf16>
    %cst_217 = arith.constant dense<0.000000e+00> : vector<8x256xf32>
    %188 = tpu.matmul %9, %187, %cst_217 {dimension_numbers = #tpu.dot_dimension_numbers<[1], [0], [0], [1], [0, 0, 1, 1], [], []>} : vector<8x8xbf16>, vector<8x256xbf16>, vector<8x256xf32> -> vector<8x256xf32>
    %189 = arith.addf %185, %188 : vector<8x256xf32>
    %c0_218 = arith.constant 0 : index
    %c3_219 = arith.constant 3 : index
    %c0_220 = arith.constant 0 : index
    %c14_221 = arith.constant 14 : index
    %190 = vector.load %arg1[%c0_218, %c3_219, %c0_220, %c14_221] : memref<1x4x8x384xbf16, #tpu.memory_space<vmem>>, vector<1x1x8x256xbf16>
    %191 = vector.shape_cast %190 : vector<1x1x8x256xbf16> to vector<8x256xbf16>
    %cst_222 = arith.constant dense<0.000000e+00> : vector<8x256xf32>
    %192 = tpu.matmul %11, %191, %cst_222 {dimension_numbers = #tpu.dot_dimension_numbers<[1], [0], [0], [1], [0, 0, 1, 1], [], []>} : vector<8x8xbf16>, vector<8x256xbf16>, vector<8x256xf32> -> vector<8x256xf32>
    %193 = arith.addf %189, %192 : vector<8x256xf32>
    %c0_223 = arith.constant 0 : index
    %c3_224 = arith.constant 3 : index
    %c0_225 = arith.constant 0 : index
    %c24_226 = arith.constant 24 : index
    %194 = vector.load %arg1[%c0_223, %c3_224, %c0_225, %c24_226] : memref<1x4x8x384xbf16, #tpu.memory_space<vmem>>, vector<1x1x8x256xbf16>
    %195 = vector.shape_cast %194 : vector<1x1x8x256xbf16> to vector<8x256xbf16>
    %cst_227 = arith.constant dense<0.000000e+00> : vector<8x256xf32>
    %196 = tpu.matmul %13, %195, %cst_227 {dimension_numbers = #tpu.dot_dimension_numbers<[1], [0], [0], [1], [0, 0, 1, 1], [], []>} : vector<8x8xbf16>, vector<8x256xbf16>, vector<8x256xf32> -> vector<8x256xf32>
    %197 = arith.addf %193, %196 : vector<8x256xf32>
    %c0_228 = arith.constant 0 : index
    %c3_229 = arith.constant 3 : index
    %c0_230 = arith.constant 0 : index
    %c25_231 = arith.constant 25 : index
    %198 = vector.load %arg1[%c0_228, %c3_229, %c0_230, %c25_231] : memref<1x4x8x384xbf16, #tpu.memory_space<vmem>>, vector<1x1x8x256xbf16>
    %199 = vector.shape_cast %198 : vector<1x1x8x256xbf16> to vector<8x256xbf16>
    %cst_232 = arith.constant dense<0.000000e+00> : vector<8x256xf32>
    %200 = tpu.matmul %15, %199, %cst_232 {dimension_numbers = #tpu.dot_dimension_numbers<[1], [0], [0], [1], [0, 0, 1, 1], [], []>} : vector<8x8xbf16>, vector<8x256xbf16>, vector<8x256xf32> -> vector<8x256xf32>
    %201 = arith.addf %197, %200 : vector<8x256xf32>
    %c0_233 = arith.constant 0 : index
    %c3_234 = arith.constant 3 : index
    %c0_235 = arith.constant 0 : index
    %c26_236 = arith.constant 26 : index
    %202 = vector.load %arg1[%c0_233, %c3_234, %c0_235, %c26_236] : memref<1x4x8x384xbf16, #tpu.memory_space<vmem>>, vector<1x1x8x256xbf16>
    %203 = vector.shape_cast %202 : vector<1x1x8x256xbf16> to vector<8x256xbf16>
    %cst_237 = arith.constant dense<0.000000e+00> : vector<8x256xf32>
    %204 = tpu.matmul %17, %203, %cst_237 {dimension_numbers = #tpu.dot_dimension_numbers<[1], [0], [0], [1], [0, 0, 1, 1], [], []>} : vector<8x8xbf16>, vector<8x256xbf16>, vector<8x256xf32> -> vector<8x256xf32>
    %205 = arith.addf %201, %204 : vector<8x256xf32>
    %206 = vector.broadcast %37 : vector<8x1xf32> to vector<8x256xf32>
    %207 = arith.addf %205, %206 : vector<8x256xf32>
    %cst_238 = arith.constant 0.000000e+00 : f32
    %208 = vector.broadcast %cst_238 : f32 to vector<8x256xf32>
    %209 = arith.maximumf %207, %208 : vector<8x256xf32>
    %210 = arith.addf %168, %209 : vector<8x256xf32>
    %cst_239 = arith.constant 2.500000e-01 : f32
    %211 = vector.broadcast %cst_239 : f32 to vector<8x256xf32>
    %212 = arith.mulf %211, %210 : vector<8x256xf32>
    %213 = vector.broadcast %40 : vector<1x256xf32> to vector<8x256xf32>
    %214 = arith.mulf %212, %213 : vector<8x256xf32>
    %215 = arith.truncf %214 : vector<8x256xf32> to vector<8x256xbf16>
    %c0_240 = arith.constant 0 : index
    %c0_241 = arith.constant 0 : index
    %216 = vector.load %arg11[%c0_240, %c0_241] : memref<8x256xbf16, #tpu.memory_space<vmem>>, vector<8x256xbf16>
    tpu.vector_store %arg11[%c0_240, %c0_241], %215 {strides = array<i32>} : memref<8x256xbf16, #tpu.memory_space<vmem>>, vector<8x256xbf16>,
    %cst_242 = arith.constant 0.000000e+00 : f32
    %217 = vector.broadcast %cst_242 : f32 to vector<8x120xf32>
    %c0_243 = arith.constant 0 : index
    %c0_244 = arith.constant 0 : index
    %218 = vector.load %arg11[%c0_243, %c0_244] : memref<8x256xbf16, #tpu.memory_space<vmem>>, vector<8x120xbf16>
    %cst_245 = arith.constant dense<0.000000e+00> : vector<8x120xf32>
    %219 = tpu.matmul %19, %218, %cst_245 {dimension_numbers = #tpu.dot_dimension_numbers<[1], [0], [0], [1], [0, 0, 1, 1], [], []>} : vector<8x8xbf16>, vector<8x120xbf16>, vector<8x120xf32> -> vector<8x120xf32>
    %220 = arith.addf %217, %219 : vector<8x120xf32>
    %c0_246 = arith.constant 0 : index
    %c2_247 = arith.constant 2 : index
    %221 = vector.load %arg11[%c0_246, %c2_247] : memref<8x256xbf16, #tpu.memory_space<vmem>>, vector<8x120xbf16>
    %cst_248 = arith.constant dense<0.000000e+00> : vector<8x120xf32>
    %222 = tpu.matmul %21, %221, %cst_248 {dimension_numbers = #tpu.dot_dimension_numbers<[1], [0], [0], [1], [0, 0, 1, 1], [], []>} : vector<8x8xbf16>, vector<8x120xbf16>, vector<8x120xf32> -> vector<8x120xf32>
    %223 = arith.addf %220, %222 : vector<8x120xf32>
    %c0_249 = arith.constant 0 : index
    %c4_250 = arith.constant 4 : index
    %224 = vector.load %arg11[%c0_249, %c4_250] : memref<8x256xbf16, #tpu.memory_space<vmem>>, vector<8x120xbf16>
    %cst_251 = arith.constant dense<0.000000e+00> : vector<8x120xf32>
    %225 = tpu.matmul %23, %224, %cst_251 {dimension_numbers = #tpu.dot_dimension_numbers<[1], [0], [0], [1], [0, 0, 1, 1], [], []>} : vector<8x8xbf16>, vector<8x120xbf16>, vector<8x120xf32> -> vector<8x120xf32>
    %226 = arith.addf %223, %225 : vector<8x120xf32>
    %c0_252 = arith.constant 0 : index
    %c24_253 = arith.constant 24 : index
    %227 = vector.load %arg11[%c0_252, %c24_253] : memref<8x256xbf16, #tpu.memory_space<vmem>>, vector<8x120xbf16>
    %cst_254 = arith.constant dense<0.000000e+00> : vector<8x120xf32>
    %228 = tpu.matmul %25, %227, %cst_254 {dimension_numbers = #tpu.dot_dimension_numbers<[1], [0], [0], [1], [0, 0, 1, 1], [], []>} : vector<8x8xbf16>, vector<8x120xbf16>, vector<8x120xf32> -> vector<8x120xf32>
    %229 = arith.addf %226, %228 : vector<8x120xf32>
    %c0_255 = arith.constant 0 : index
    %c26_256 = arith.constant 26 : index
    %230 = vector.load %arg11[%c0_255, %c26_256] : memref<8x256xbf16, #tpu.memory_space<vmem>>, vector<8x120xbf16>
    %cst_257 = arith.constant dense<0.000000e+00> : vector<8x120xf32>
    %231 = tpu.matmul %27, %230, %cst_257 {dimension_numbers = #tpu.dot_dimension_numbers<[1], [0], [0], [1], [0, 0, 1, 1], [], []>} : vector<8x8xbf16>, vector<8x120xbf16>, vector<8x120xf32> -> vector<8x120xf32>
    %232 = arith.addf %229, %231 : vector<8x120xf32>
    %c0_258 = arith.constant 0 : index
    %c28 = arith.constant 28 : index
    %233 = vector.load %arg11[%c0_258, %c28] : memref<8x256xbf16, #tpu.memory_space<vmem>>, vector<8x120xbf16>
    %cst_259 = arith.constant dense<0.000000e+00> : vector<8x120xf32>
    %234 = tpu.matmul %29, %233, %cst_259 {dimension_numbers = #tpu.dot_dimension_numbers<[1], [0], [0], [1], [0, 0, 1, 1], [], []>} : vector<8x8xbf16>, vector<8x120xbf16>, vector<8x120xf32> -> vector<8x120xf32>
    %235 = arith.addf %232, %234 : vector<8x120xf32>
    %c0_260 = arith.constant 0 : index
    %c48 = arith.constant 48 : index
    %236 = vector.load %arg11[%c0_260, %c48] : memref<8x256xbf16, #tpu.memory_space<vmem>>, vector<8x120xbf16>
    %cst_261 = arith.constant dense<0.000000e+00> : vector<8x120xf32>
    %237 = tpu.matmul %31, %236, %cst_261 {dimension_numbers = #tpu.dot_dimension_numbers<[1], [0], [0], [1], [0, 0, 1, 1], [], []>} : vector<8x8xbf16>, vector<8x120xbf16>, vector<8x120xf32> -> vector<8x120xf32>
    %238 = arith.addf %235, %237 : vector<8x120xf32>
    %c0_262 = arith.constant 0 : index
    %c50 = arith.constant 50 : index
    %239 = vector.load %arg11[%c0_262, %c50] : memref<8x256xbf16, #tpu.memory_space<vmem>>, vector<8x120xbf16>
    %cst_263 = arith.constant dense<0.000000e+00> : vector<8x120xf32>
    %240 = tpu.matmul %33, %239, %cst_263 {dimension_numbers = #tpu.dot_dimension_numbers<[1], [0], [0], [1], [0, 0, 1, 1], [], []>} : vector<8x8xbf16>, vector<8x120xbf16>, vector<8x120xf32> -> vector<8x120xf32>
    %241 = arith.addf %238, %240 : vector<8x120xf32>
    %c0_264 = arith.constant 0 : index
    %c52 = arith.constant 52 : index
    %242 = vector.load %arg11[%c0_264, %c52] : memref<8x256xbf16, #tpu.memory_space<vmem>>, vector<8x120xbf16>
    %cst_265 = arith.constant dense<0.000000e+00> : vector<8x120xf32>
    %243 = tpu.matmul %35, %242, %cst_265 {dimension_numbers = #tpu.dot_dimension_numbers<[1], [0], [0], [1], [0, 0, 1, 1], [], []>} : vector<8x8xbf16>, vector<8x120xbf16>, vector<8x120xf32> -> vector<8x120xf32>
    %244 = arith.addf %241, %243 : vector<8x120xf32>
    %245 = vector.broadcast %38 : vector<8x1xf32> to vector<8x120xf32>
    %246 = arith.addf %244, %245 : vector<8x120xf32>
    %cst_266 = arith.constant 0.000000e+00 : f32
    %247 = vector.broadcast %cst_266 : f32 to vector<8x120xf32>
    %248 = arith.maximumf %246, %247 : vector<8x120xf32>
    %249 = vector.broadcast %41 : vector<1x120xf32> to vector<8x120xf32>
    %250 = arith.mulf %248, %249 : vector<8x120xf32>
    %251 = vector.extract_strided_slice %250 {offsets = [0, 0], sizes = [8, 116], strides = [1, 1]} : vector<8x120xf32> to vector<8x116xf32>
    %252 = vector.extract_strided_slice %250 {offsets = [0, 1], sizes = [8, 116], strides = [1, 1]} : vector<8x120xf32> to vector<8x116xf32>
    %253 = arith.maximumf %251, %252 : vector<8x116xf32>
    %254 = vector.extract_strided_slice %250 {offsets = [0, 2], sizes = [8, 116], strides = [1, 1]} : vector<8x120xf32> to vector<8x116xf32>
    %255 = arith.maximumf %253, %254 : vector<8x116xf32>
    %256 = vector.extract_strided_slice %255 {offsets = [0, 0], sizes = [8, 92], strides = [1, 1]} : vector<8x116xf32> to vector<8x92xf32>
    %257 = vector.extract_strided_slice %255 {offsets = [0, 12], sizes = [8, 92], strides = [1, 1]} : vector<8x116xf32> to vector<8x92xf32>
    %258 = arith.maximumf %256, %257 : vector<8x92xf32>
    %259 = vector.extract_strided_slice %255 {offsets = [0, 24], sizes = [8, 92], strides = [1, 1]} : vector<8x116xf32> to vector<8x92xf32>
    %260 = arith.maximumf %258, %259 : vector<8x92xf32>
    %261 = arith.truncf %260 : vector<8x92xf32> to vector<8x92xbf16>
    %cst_267 = arith.constant dense<0.000000e+00> : vector<16x92xf32>
    %262 = tpu.matmul %36, %261, %cst_267 {dimension_numbers = #tpu.dot_dimension_numbers<[1], [0], [0], [1], [0, 0, 1, 1], [], []>} : vector<16x8xbf16>, vector<8x92xbf16>, vector<16x92xf32> -> vector<16x92xf32>
    %263 = vector.broadcast %39 : vector<16x1xf32> to vector<16x92xf32>
    %264 = arith.addf %262, %263 : vector<16x92xf32>
    %cst_268 = arith.constant 0.000000e+00 : f32
    %265 = vector.broadcast %cst_268 : f32 to vector<16x92xf32>
    %266 = arith.maximumf %264, %265 : vector<16x92xf32>
    %267 = vector.extract_strided_slice %266 {offsets = [0, 0], sizes = [16, 8], strides = [1, 1]} : vector<16x92xf32> to vector<16x8xf32>
    %268 = vector.extract_strided_slice %266 {offsets = [0, 12], sizes = [16, 8], strides = [1, 1]} : vector<16x92xf32> to vector<16x8xf32>
    %269 = vector.extract_strided_slice %266 {offsets = [0, 24], sizes = [16, 8], strides = [1, 1]} : vector<16x92xf32> to vector<16x8xf32>
    %270 = vector.extract_strided_slice %266 {offsets = [0, 36], sizes = [16, 8], strides = [1, 1]} : vector<16x92xf32> to vector<16x8xf32>
    %271 = vector.extract_strided_slice %266 {offsets = [0, 48], sizes = [16, 8], strides = [1, 1]} : vector<16x92xf32> to vector<16x8xf32>
    %272 = vector.extract_strided_slice %266 {offsets = [0, 60], sizes = [16, 8], strides = [1, 1]} : vector<16x92xf32> to vector<16x8xf32>
    %273 = vector.extract_strided_slice %266 {offsets = [0, 72], sizes = [16, 8], strides = [1, 1]} : vector<16x92xf32> to vector<16x8xf32>
    %274 = vector.extract_strided_slice %266 {offsets = [0, 84], sizes = [16, 8], strides = [1, 1]} : vector<16x92xf32> to vector<16x8xf32>
    %275 = tpu.concatenate %267, %268, %269, %270, %271, %272, %273, %274 in 1 : vector<16x8xf32>, vector<16x8xf32>, vector<16x8xf32>, vector<16x8xf32>, vector<16x8xf32>, vector<16x8xf32>, vector<16x8xf32>, vector<16x8xf32> -> vector<16x64xf32>
    %c0_269 = arith.constant 0 : index
    %c0_270 = arith.constant 0 : index
    %c0_271 = arith.constant 0 : index
    %276 = vector.load %arg10[%c0_269, %c0_270, %c0_271] : memref<1x16x64xf32, #tpu.memory_space<vmem>>, vector<1x16x64xf32>
    %277 = vector.shape_cast %276 : vector<1x16x64xf32> to vector<16x64xf32>
    %278 = vector.shape_cast %275 : vector<16x64xf32> to vector<1x16x64xf32>
    tpu.vector_store %arg10[%c0_269, %c0_270, %c0_271], %278 {strides = array<i32>} : memref<1x16x64xf32, #tpu.memory_space<vmem>>, vector<1x16x64xf32>,
    return
  }
  func.func @transform_0(%arg0: i32) -> (i32, i32, i32, i32) {
    %c0_i32 = arith.constant 0 : i32
    %c0_i32_0 = arith.constant 0 : i32
    %c0_i32_1 = arith.constant 0 : i32
    %c0_i32_2 = arith.constant 0 : i32
    return %arg0, %c0_i32, %c0_i32_0, %c0_i32_1 : i32, i32, i32, i32
  }
  func.func @transform_1(%arg0: i32) -> (i32, i32, i32) {
    %c0_i32 = arith.constant 0 : i32
    %c0_i32_0 = arith.constant 0 : i32
    %c0_i32_1 = arith.constant 0 : i32
    %c0_i32_2 = arith.constant 0 : i32
    return %c0_i32, %c0_i32_0, %c0_i32_1 : i32, i32, i32
  }
  func.func @transform_2(%arg0: i32) -> (i32, i32) {
    %c0_i32 = arith.constant 0 : i32
    %c0_i32_0 = arith.constant 0 : i32
    %c0_i32_1 = arith.constant 0 : i32
    return %c0_i32, %c0_i32_0 : i32, i32
  }
  func.func @transform_3(%arg0: i32) -> (i32, i32) {
    %c0_i32 = arith.constant 0 : i32
    %c0_i32_0 = arith.constant 0 : i32
    %c0_i32_1 = arith.constant 0 : i32
    return %c0_i32, %c0_i32_0 : i32, i32
  }
  func.func @transform_4(%arg0: i32) -> (i32, i32, i32) {
    %c0_i32 = arith.constant 0 : i32
    %c0_i32_0 = arith.constant 0 : i32
    %c0_i32_1 = arith.constant 0 : i32
    %c0_i32_2 = arith.constant 0 : i32
    return %c0_i32, %c0_i32_0, %c0_i32_1 : i32, i32, i32
  }
  func.func @transform_5(%arg0: i32) -> (i32, i32) {
    %c0_i32 = arith.constant 0 : i32
    %c0_i32_0 = arith.constant 0 : i32
    %c0_i32_1 = arith.constant 0 : i32
    return %c0_i32, %c0_i32_0 : i32, i32
  }
  func.func @transform_6(%arg0: i32) -> (i32, i32) {
    %c0_i32 = arith.constant 0 : i32
    %c0_i32_0 = arith.constant 0 : i32
    %c0_i32_1 = arith.constant 0 : i32
    return %c0_i32, %c0_i32_0 : i32, i32
  }
  func.func @transform_7(%arg0: i32) -> (i32, i32) {
    %c0_i32 = arith.constant 0 : i32
    %c0_i32_0 = arith.constant 0 : i32
    %c0_i32_1 = arith.constant 0 : i32
    return %c0_i32, %c0_i32_0 : i32, i32
  }
  func.func @transform_8(%arg0: i32) -> (i32, i32) {
    %c0_i32 = arith.constant 0 : i32
    %c0_i32_0 = arith.constant 0 : i32
    %c0_i32_1 = arith.constant 0 : i32
    return %c0_i32, %c0_i32_0 : i32, i32
  }
  func.func @transform_9(%arg0: i32) -> (i32, i32, i32) {
    %c0_i32 = arith.constant 0 : i32
    %c0_i32_0 = arith.constant 0 : i32
    %c0_i32_1 = arith.constant 0 : i32
    return %arg0, %c0_i32, %c0_i32_0 : i32, i32, i32
  }
}

</mosaic_0001>

<bundles_post_ra>
// kernel: stm_renet_block_b.1
= control target key start
LH: loop header
LB: loop body
LE: loop exit
PB: predicated region body
PF: predicated region fallthrough
CT: control target
= control target key end

     0   :  { %s2601_s30 = smov 0   ;;  %s3272_s0 = inlined_call_operand.vmem [shape: bf16[2,4,8,384], index: 0, kind: input, shape index: {}]   ;;  %s3273_s1 = inlined_call_operand.vmem [shape: bf16[9,8,8], index: 1, kind: input, shape index: {}]   ;;  %s3274_s2 = inlined_call_operand.vmem [shape: f32[8,1], index: 2, kind: input, shape index: {}]   ;;  %s3275_s3 = inlined_call_operand.vmem [shape: f32[1,256], index: 3, kind: input, shape index: {}]   ;;  %s3276_s4 = inlined_call_operand.vmem [shape: bf16[9,8,8], index: 4, kind: input, shape index: {}]   ;;  %s3277_s5 = inlined_call_operand.vmem [shape: f32[8,1], index: 5, kind: input, shape index: {}]   ;;  %s3278_s6 = inlined_call_operand.vmem [shape: f32[1,120], index: 6, kind: input, shape index: {}]   ;;  %s3279_s7 = inlined_call_operand.vmem [shape: bf16[16,8], index: 7, kind: input, shape index: {}]   ;;  %s3280_s8 = inlined_call_operand.vmem [shape: f32[16,1], index: 8, kind: input, shape index: {}]   ;;  %s3281_s9 = inlined_call_operand.vmem [shape: f32[2,16,64], index: 9, kind: output, shape index: {}]  }
   0x1 LB: > { %s2375_s10 = sadd.s32 4294967295, %s2532_s30   ;;  %p2379_p0 = scmp.ge.s32.totalorder %s2532_s30, 1  ;;  %s2532_s30 = sphi %s2601_s30, %s19_s30  }
   0x2   : > { %p287_p1 = scmp.lt.s32.totalorder %s2532_s30, 3 }
   0x4   : > { %p288_p2 = pnand %p2379_p0, %p287_p1 }
   0x5   : > { %p323_p3 = scmp.lt.s32.totalorder (!%p288_p2), %s2375_s10, 1  ;;  %s2534_s15 = smov (!%p288_p2), 127  }
   0x6   : > { %291 = sbr.rel (%p288_p2) target bundleno = 1388 (0x56c), region = 56  ;;  %s2535_s16 = smov (!%p288_p2), 116  }
   0x7   : > { %s2536_s17 = smov (!%p288_p2), 126   ;;  %s2537_s18 = smov (!%p288_p2), 114  }
   0x8   : > { %s2538_s19 = smov (!%p288_p2), 115   ;;  %s2539_s20 = smov (!%p288_p2), 103  }
   0x9   : > { %s2540_s21 = smov (!%p288_p2), 104   ;;  %s2541_s22 = smov (!%p288_p2), 102  }
   0xa   : > { %s2543_s25 = smov (!%p288_p2), 124   ;;  %s2544_s26 = smov (!%p288_p2), 80  }
   0xb   : > { %s3283_s10 = smov (!%p323_p3, %s2375_s10), 1  ;;  %vm399_vm0 = vcmask 1043456   ;;  %v2669_v18 = vld [vmem:[%s3273_s1] sm:$0xf]  ;;  %vm395_vm1 = vcmask 64512   ;;  %vm519_vm2 = vcmask 949248  }
   0xc   : > { %s2495_s11 = smul.u32 48, %s3283_s10  ;;  %v2690_v23 = vld [vmem:[%s3273_s1 + $0xc] sm:$0xf]  ;;  %vm392_vm3 = vcmask 1039360   ;;  %v2721_v41 = vld [vmem:[%s3273_s1 + $0x4] sm:$0xf] }
   0xd   : > { %vm473_vm4 = vcmask 1031168   ;;  %vm611_vm5 = vcmask 932864   ;;  %v2753_v60 = vld [vmem:[%s3273_s1 + $0x8] sm:$0xf]  ;;  %v2758_v61 = vld [vmem:[%s3273_s1 + $0x14] sm:$0xf] }
   0xe   : > { %s2615_s14 = scalar_lea.vmem %s3272_s0, %s2495_s11  ;;  %vm565_vm6 = vcmask 941056   ;;  %vm703_vm7 = vcmask 842752   ;;  %vm657_vm8 = vcmask 850944   ;;  %vm749_vm9 = vcmask 834560   ;;  %s2545_s27 = smov 100  }
   0xf   : > { %v377_v0 = vld [vmem:[%s2615_s14 + $0x8] sm:$0xf]  ;;  %v376_v1 = vld [vmem:[%s2615_s14] sm:$0xff]  ;;  %v2417_v8 = vld [vmem:[%s2615_s14 + $0xc] sm:$0xff]  ;;  %s2546_s28 = smov 76   ;;  %s2547_s29 = smov 78  }
  0x10   : > { %v382_v2 = vunpack.c.l.b16 %v377_v0  ;;  %v380_v3 = vunpack.c.l.b16 %v376_v1  ;;  %v381_v4 = vunpack.c.h.b16 %v376_v1  ;;  %v2418_v9 = vld [vmem:[%s2615_s14 + $0x14] sm:$0xf]  ;;  %v805_v10 = vunpack.c.l.b16 %v2417_v8  ;;  %v2437_v28 = vld [vmem:[%s2615_s14 + $0x18] sm:$0xff]  ;;  %v2438_v50 = vld [vmem:[%s2615_s14 + $0x20] sm:$0xf]  ;;  %s2548_s11 = smov 120  }
  0x11   : > { %v806_v11 = vunpack.c.h.b16 %v2417_v8  ;;  %v807_v12 = vunpack.c.l.b16 %v2418_v9  ;;  %v1188_v29 = vunpack.c.l.b16 %v2437_v28  ;;  %v1189_v32 = vunpack.c.h.b16 %v2437_v28 }
  0x12   : > { %v385_v5 = vpack.c.b16 %v382_v2, %v382_v2  ;;  %v383_v6 = vpack.c.b16 %v380_v3, %v380_v3  ;;  %v384_v7 = vpack.c.b16 %v381_v4, %v381_v4  ;;  %v2642_v13 = vpack.c.b16 %v805_v10, %v805_v10 }
  0x13   : > { %v2644_v14 = vpack.c.b16 %v806_v11, %v806_v11  ;;  %v810_v15 = vpack.c.b16 %v807_v12, %v807_v12  ;;  %v2716_v40 = vpack.c.b16 %v1188_v29, %v1188_v29  ;;  %v2723_v42 = vpack.c.b16 %v1189_v32, %v1189_v32  ;;  %v2791_v11 = vld [vmem:[%s3273_s1 + $0x10] sm:$0xf]  ;;  %v2457_v32 = vld [vmem:[%s2615_s14 + $0x24] sm:$0xff] }
  0x14   : > { %390 = vrot.lane.b32.xlu1 %v385_v5, %s2534_s15  ;;  %386 = vrot.lane.b32.xlu0 %v383_v6, %s2534_s15  ;;  %v436_v16 = vsel %vm399_vm0, %v383_v6, 0  ;;  %v439_v17 = vsel %vm399_vm0, %v384_v7, 0  ;;  %v1190_v51 = vunpack.c.l.b16 %v2438_v50  ;;  %vm2112_vm10 = vcmask 654336  }
  0x15   : > { %515 = vrot.lane.b32.xlu2 %v384_v7, %s2535_s16  ;;  %448 = vmatpush.bf16.msra.mxu2 %v436_v16  ;;  %vm2164_vm11 = vcmask 621568   ;;  %vm2138_vm12 = vcmask 637952   ;;  %vm2086_vm13 = vcmask 818176   ;;  %vm2299_vm14 = vcmask 130048  }
  0x16   : > { %461 = vmatpush.bf16.msra.mxu3 %v439_v17  ;;  %v2746_v57 = vpack.c.b16 %v1190_v51, %v1190_v51  ;;  %vm2302_vm15 = vcmask 195584  }
  0x18   : > { %2401 = vmatmul.msk.bf16.vlgmr.msra.gmra.mxu2 %vm395_vm1, %v2669_v18 }
  0x19   : > { %2402 = vmatmul.msk.bf16.vlgmr.msra.gmra.mxu3 %vm395_vm1, %v2669_v18 }
  0x1c   : > { %513 = vrot.lane.b32.xlu1 %v383_v6, %s2535_s16  ;;  %388 = vrot.lane.b32.xlu0 %v384_v7, %s2534_s15 }
  0x1d   : > { %517 = vrot.lane.b32.xlu2 %v385_v5, %s2535_s16 }
  0x24   : > { %467 = vrot.lane.b32.xlu0 %v383_v6, %s2536_s17  ;;  %469 = vrot.lane.b32.xlu1 %v384_v7, %s2536_s17 }
  0x25   : > { %471 = vrot.lane.b32.xlu2 %v385_v5, %s2536_s17 }
  0x2c   : > { %605 = vrot.lane.b32.xlu0 %v383_v6, %s2537_s18  ;;  %607 = vrot.lane.b32.xlu1 %v384_v7, %s2537_s18 }
  0x2d   : > { %609 = vrot.lane.b32.xlu2 %v385_v5, %s2537_s18 }
  0x34   : > { %559 = vrot.lane.b32.xlu0 %v383_v6, %s2538_s19  ;;  %561 = vrot.lane.b32.xlu1 %v384_v7, %s2538_s19 }
  0x35   : > { %563 = vrot.lane.b32.xlu2 %v385_v5, %s2538_s19 }
  0x3c   : > { %697 = vrot.lane.b32.xlu0 %v383_v6, %s2539_s20  ;;  %699 = vrot.lane.b32.xlu1 %v384_v7, %s2539_s20 }
  0x3d   : > { %701 = vrot.lane.b32.xlu2 %v385_v5, %s2539_s20 }
  0x44   : > { %651 = vrot.lane.b32.xlu0 %v383_v6, %s2540_s21  ;;  %653 = vrot.lane.b32.xlu1 %v384_v7, %s2540_s21 }
  0x45   : > { %655 = vrot.lane.b32.xlu2 %v385_v5, %s2540_s21 }
  0x4c   : > { %811 = vrot.lane.b32.xlu0 %v2642_v13, %s2534_s15  ;;  %813 = vrot.lane.b32.xlu1 %v2644_v14, %s2534_s15 }
  0x4d   : > { %815 = vrot.lane.b32.xlu2 %v810_v15, %s2534_s15 }
  0x54   : > { %743 = vrot.lane.b32.xlu0 %v383_v6, %s2541_s22  ;;  %745 = vrot.lane.b32.xlu1 %v384_v7, %s2541_s22 }
  0x55   : > { %747 = vrot.lane.b32.xlu2 %v385_v5, %s2541_s22 }
  0x5c   : > { %883 = vrot.lane.b32.xlu0 %v2642_v13, %s2536_s17  ;;  %885 = vrot.lane.b32.xlu1 %v2644_v14, %s2536_s17 }
  0x5d   : > { %887 = vrot.lane.b32.xlu2 %v810_v15, %s2536_s17 }
  0x64   : > { %967 = vrot.lane.b32.xlu0 %v2642_v13, %s2538_s19  ;;  %969 = vrot.lane.b32.xlu1 %v2644_v14, %s2538_s19 }
  0x65   : > { %971 = vrot.lane.b32.xlu2 %v810_v15, %s2538_s19 }
  0x6c   : > { %925 = vrot.lane.b32.xlu0 %v2642_v13, %s2535_s16  ;;  %927 = vrot.lane.b32.xlu1 %v2644_v14, %s2535_s16 }
  0x6d   : > { %929 = vrot.lane.b32.xlu2 %v810_v15, %s2535_s16 }
  0x6f   : > { %v516_v19 = vpop.permute.xlu2 %515 }
  0x74   : > { %1051 = vrot.lane.b32.xlu0 %v2642_v13, %s2540_s21  ;;  %1053 = vrot.lane.b32.xlu1 %v2644_v14, %s2540_s21 }
  0x75   : > { %1055 = vrot.lane.b32.xlu2 %v810_v15, %s2540_s21 }
  0x77   : > { %v518_v20 = vpop.permute.xlu2 %517 }
  0x78   : > { %v521_v21 = vsel %vm519_vm2, %v516_v19, %v518_v20 }
  0x79   : > { %v529_v22 = vsel %vm399_vm0, %v521_v21, 0 }
  0x7a   : > { %551 = vmatpush.bf16.msrb.mxu3 %v529_v22 }
  0x7c   : > { %1009 = vrot.lane.b32.xlu0 %v2642_v13, %s2537_s18  ;;  %1011 = vrot.lane.b32.xlu1 %v2644_v14, %s2537_s18 }
  0x7d   : > { %2406 = vmatmul.msk.bf16.vlgmr.msrb.gmra.mxu3 %vm395_vm1, %v2690_v23  ;;  %1013 = vrot.lane.b32.xlu2 %v810_v15, %s2537_s18 }
  0x7f   : > { %v472_v24 = vpop.permute.xlu2 %471 }
  0x84   : > { %1135 = vrot.lane.b32.xlu0 %v2642_v13, %s2541_s22  ;;  %1137 = vrot.lane.b32.xlu1 %v2644_v14, %s2541_s22 }
  0x85   : > { %1139 = vrot.lane.b32.xlu2 %v810_v15, %s2541_s22 }
  0x86   : > { %v391_v25 = vpop.permute.xlu1 %390  ;;  %v387_v26 = vpop.permute.xlu0 %386 }
  0x87   : > { %v610_v27 = vpop.permute.xlu2 %609 }
  0x8c   : > { %1093 = vrot.lane.b32.xlu0 %v2642_v13, %s2539_s20  ;;  %1095 = vrot.lane.b32.xlu1 %v2644_v14, %s2539_s20 }
  0x8d   : > { %1097 = vrot.lane.b32.xlu2 %v810_v15, %s2539_s20  ;;  %v2796_v15 = vld [vmem:[%s3273_s1 + $0x1c] sm:$0xf] }
  0x8e   : > { %v514_v30 = vpop.permute.xlu1 %513  ;;  %v389_v31 = vpop.permute.xlu0 %388 }
  0x8f   : > { %v393_v33 = vsel %vm392_vm3, %v387_v26, %v389_v31  ;;  %v394_v34 = vsel %vm392_vm3, %v389_v31, %v391_v25  ;;  %v520_v35 = vsel %vm519_vm2, %v514_v30, %v516_v19  ;;  %v564_v36 = vpop.permute.xlu2 %563  ;;  %v2829_v31 = vld [vmem:[%s3273_s1 + $0x18] sm:$0xf] }
  0x90   : > { %v401_v37 = vsel %vm399_vm0, %v393_v33, 0  ;;  %v404_v38 = vsel %vm399_vm0, %v394_v34, 0  ;;  %v526_v39 = vsel %vm399_vm0, %v520_v35, 0  ;;  %v1571_v34 = vunpack.c.l.b16 %v2457_v32 }
  0x91   : > { %413 = vmatpush.bf16.msra.mxu0 %v401_v37  ;;  %426 = vmatpush.bf16.msra.mxu1 %v404_v38  ;;  %v1572_v37 = vunpack.c.h.b16 %v2457_v32 }
  0x92   : > { %538 = vmatpush.bf16.msrb.mxu2 %v526_v39 }
  0x94   : > { %1194 = vrot.lane.b32.xlu0 %v2716_v40, %s2534_s15  ;;  %2399 = vmatmul.msk.bf16.vlgmr.msra.gmra.mxu0 %vm395_vm1, %v2721_v41 }
  0x95   : > { %2400 = vmatmul.msk.bf16.vlgmr.msra.gmra.mxu1 %vm395_vm1, %v2721_v41  ;;  %2405 = vmatmul.msk.bf16.vlgmr.msrb.gmra.mxu2 %vm395_vm1, %v2690_v23 }
  0x96   : > { %v468_v43 = vpop.permute.xlu0 %467  ;;  %v470_v44 = vpop.permute.xlu1 %469  ;;  %1196 = vrot.lane.b32.xlu1 %v2723_v42, %s2534_s15  ;;  %1198 = vrot.lane.b32.xlu2 %v2746_v57, %s2534_s15 }
  0x97   : > { %v474_v45 = vsel %vm473_vm4, %v468_v43, %v470_v44  ;;  %v475_v46 = vsel %vm473_vm4, %v470_v44, %v472_v24  ;;  %v702_v47 = vpop.permute.xlu2 %701  ;;  %v852_v43 = vsel %vm399_vm0, %v2642_v13, 0  ;;  %v855_v44 = vsel %vm399_vm0, %v2644_v14, 0 }
  0x98   : > { %v480_v48 = vsel %vm399_vm0, %v474_v45, 0  ;;  %v483_v49 = vsel %vm399_vm0, %v475_v46, 0 }
  0x99   : > { %492 = vmatpush.bf16.msrb.mxu0 %v480_v48  ;;  %505 = vmatpush.bf16.msrb.mxu1 %v483_v49  ;;  %v2856_v48 = vpack.c.b16 %v1572_v37, %v1572_v37 }
  0x9c   : > { %1308 = vrot.lane.b32.xlu0 %v2716_v40, %s2535_s16 }
  0x9e   : > { %v606_v52 = vpop.permute.xlu0 %605  ;;  %v608_v53 = vpop.permute.xlu1 %607  ;;  %1310 = vrot.lane.b32.xlu1 %v2723_v42, %s2535_s16  ;;  %1312 = vrot.lane.b32.xlu2 %v2746_v57, %s2535_s16 }
  0x9f   : > { %v612_v54 = vsel %vm611_vm5, %v606_v52, %v608_v53  ;;  %v613_v55 = vsel %vm611_vm5, %v608_v53, %v610_v27  ;;  %v656_v56 = vpop.permute.xlu2 %655 }
  0xa0   : > { %v618_v58 = vsel %vm399_vm0, %v612_v54, 0  ;;  %v621_v59 = vsel %vm399_vm0, %v613_v55, 0  ;;  %v2871_v54 = vld [vmem:[%s3273_s1 + $0x20] sm:$0xf]  ;;  %v2458_v55 = vld [vmem:[%s2615_s14 + $0x2c] sm:$0xf] }
  0xa1   : > { %630 = vmatpush.bf16.msra.mxu2 %v618_v58  ;;  %643 = vmatpush.bf16.msra.mxu3 %v621_v59  ;;  %s2549_s14 = smov 108  }
  0xa4   : > { %1266 = vrot.lane.b32.xlu0 %v2716_v40, %s2536_s17  ;;  %2403 = vmatmul.msk.bf16.vlgmr.msrb.gmra.mxu0 %vm395_vm1, %v2753_v60 }
  0xa5   : > { %2404 = vmatmul.msk.bf16.vlgmr.msrb.gmra.mxu1 %vm395_vm1, %v2753_v60  ;;  %2409 = vmatmul.msk.bf16.vlgmr.msra.gmra.mxu2 %vm395_vm1, %v2758_v61 }
  0xa6   : > { %v560_v62 = vpop.permute.xlu0 %559  ;;  %2410 = vmatmul.msk.bf16.vlgmr.msra.gmra.mxu3 %vm395_vm1, %v2758_v61  ;;  %v562_v63 = vpop.permute.xlu1 %561  ;;  %1268 = vrot.lane.b32.xlu1 %v2723_v42, %s2536_s17 }
  0xa7   : > { %v566_v0 = vsel %vm565_vm6, %v560_v62, %v562_v63  ;;  %v567_v1 = vsel %vm565_vm6, %v562_v63, %v564_v36  ;;  %v816_v2 = vpop.permute.xlu2 %815  ;;  %1270 = vrot.lane.b32.xlu2 %v2746_v57, %s2536_s17 }
  0xa8   : > { %v572_v3 = vsel %vm399_vm0, %v566_v0, 0  ;;  %v575_v4 = vsel %vm399_vm0, %v567_v1, 0 }
  0xa9   : > { %584 = vmatpush.bf16.msra.mxu0 %v572_v3  ;;  %597 = vmatpush.bf16.msra.mxu1 %v575_v4 }
  0xac   : > { %1392 = vrot.lane.b32.xlu0 %v2716_v40, %s2537_s18 }
  0xae   : > { %v698_v5 = vpop.permute.xlu0 %697  ;;  %v700_v6 = vpop.permute.xlu1 %699  ;;  %1394 = vrot.lane.b32.xlu1 %v2723_v42, %s2537_s18 }
  0xaf   : > { %v704_v7 = vsel %vm703_vm7, %v698_v5, %v700_v6  ;;  %v705_v8 = vsel %vm703_vm7, %v700_v6, %v702_v47  ;;  %v748_v12 = vpop.permute.xlu2 %747  ;;  %1396 = vrot.lane.b32.xlu2 %v2746_v57, %s2537_s18  ;;  %v2854_v47 = vpack.c.b16 %v1571_v34, %v1571_v34 }
  0xb0   : > { %v710_v9 = vsel %vm399_vm0, %v704_v7, 0  ;;  %v713_v10 = vsel %vm399_vm0, %v705_v8, 0 }
  0xb1   : > { %722 = vmatpush.bf16.msrb.mxu2 %v710_v9  ;;  %735 = vmatpush.bf16.msrb.mxu3 %v713_v10 }
  0xb4   : > { %1350 = vrot.lane.b32.xlu0 %v2716_v40, %s2538_s19  ;;  %2407 = vmatmul.msk.bf16.vlgmr.msra.gmra.mxu0 %vm395_vm1, %v2791_v11 }
  0xb5   : > { %2408 = vmatmul.msk.bf16.vlgmr.msra.gmra.mxu1 %vm395_vm1, %v2791_v11  ;;  %2413 = vmatmul.msk.bf16.vlgmr.msrb.gmra.mxu2 %vm395_vm1, %v2796_v15 }
  0xb6   : > { %v652_v16 = vpop.permute.xlu0 %651  ;;  %2414 = vmatmul.msk.bf16.vlgmr.msrb.gmra.mxu3 %vm395_vm1, %v2796_v15  ;;  %v654_v17 = vpop.permute.xlu1 %653  ;;  %1352 = vrot.lane.b32.xlu1 %v2723_v42, %s2538_s19 }
  0xb7   : > { %v658_v19 = vsel %vm657_vm8, %v652_v16, %v654_v17  ;;  %v659_v20 = vsel %vm657_vm8, %v654_v17, %v656_v56  ;;  %v888_v24 = vpop.permute.xlu2 %887  ;;  %1354 = vrot.lane.b32.xlu2 %v2746_v57, %s2538_s19  ;;  %v1573_v56 = vunpack.c.l.b16 %v2458_v55 }
  0xb8   : > { %v664_v21 = vsel %vm399_vm0, %v658_v19, 0  ;;  %v667_v22 = vsel %vm399_vm0, %v659_v20, 0 }
  0xb9   : > { %676 = vmatpush.bf16.msrb.mxu0 %v664_v21  ;;  %689 = vmatpush.bf16.msrb.mxu1 %v667_v22  ;;  %v2890_v0 = vpack.c.b16 %v1573_v56, %v1573_v56  ;;  %v2924_v21 = vpop.f32.mrf.mxu2  ;;  %v2926_v22 = vpop.f32.mrf.mxu3 }
  0xbc   : > { %1476 = vrot.lane.b32.xlu0 %v2716_v40, %s2539_s20 }
  0xbe   : > { %v812_v25 = vpop.permute.xlu0 %811  ;;  %v814_v26 = vpop.permute.xlu1 %813  ;;  %1478 = vrot.lane.b32.xlu1 %v2723_v42, %s2539_s20 }
  0xbf   : > { %v817_v27 = vsel %vm392_vm3, %v812_v25, %v814_v26  ;;  %v818_v28 = vsel %vm392_vm3, %v814_v26, %v816_v2  ;;  %v972_v33 = vpop.permute.xlu2 %971  ;;  %1480 = vrot.lane.b32.xlu2 %v2746_v57, %s2539_s20 }
  0xc0   : > { %v820_v29 = vsel %vm399_vm0, %v817_v27, 0  ;;  %v823_v30 = vsel %vm399_vm0, %v818_v28, 0 }
  0xc1   : > { %832 = vmatpush.bf16.msra.mxu2 %v820_v29  ;;  %845 = vmatpush.bf16.msra.mxu3 %v823_v30  ;;  %v452_v32 = vpop.f32.mrf.mxu2 }
  0xc4   : > { %1434 = vrot.lane.b32.xlu0 %v2716_v40, %s2540_s21  ;;  %2411 = vmatmul.msk.bf16.vlgmr.msrb.gmra.mxu0 %vm395_vm1, %v2829_v31 }
  0xc5   : > { %2412 = vmatmul.msk.bf16.vlgmr.msrb.gmra.mxu1 %vm395_vm1, %v2829_v31  ;;  %2419 = vmatmul.msk.bf16.vlgmr.msra.gmra.mxu2 %vm395_vm1, %v2721_v41 }
  0xc6   : > { %v744_v35 = vpop.permute.xlu0 %743  ;;  %2420 = vmatmul.msk.bf16.vlgmr.msra.gmra.mxu3 %vm395_vm1, %v2721_v41  ;;  %v746_v36 = vpop.permute.xlu1 %745  ;;  %1436 = vrot.lane.b32.xlu1 %v2723_v42, %s2540_s21 }
  0xc7   : > { %v750_v38 = vsel %vm749_vm9, %v744_v35, %v746_v36  ;;  %v751_v39 = vsel %vm749_vm9, %v746_v36, %v748_v12  ;;  %v930_v13 = vpop.permute.xlu2 %929  ;;  %1438 = vrot.lane.b32.xlu2 %v2746_v57, %s2540_s21 }
  0xc8   : > { %v756_v45 = vsel %vm399_vm0, %v750_v38, 0  ;;  %v759_v46 = vsel %vm399_vm0, %v751_v39, 0  ;;  %v2542_v39 = vmov 0  }
  0xc9   : > { %768 = vmatpush.bf16.msra.mxu0 %v756_v45  ;;  %781 = vmatpush.bf16.msra.mxu1 %v759_v46 }
  0xca   : > { %2521 = vset.pattern.permute.xlu0 %v2542_v39  ;;  %2522 = vset.pattern.permute.xlu1 %v2542_v39 }
  0xcc   : > { %1577 = vrot.lane.b32.xlu0 %v2854_v47, %s2534_s15 }
  0xcd   : > { %864 = vmatpush.bf16.msrb.mxu0 %v852_v43  ;;  %877 = vmatpush.bf16.msrb.mxu1 %v855_v44  ;;  %v1235_v43 = vsel %vm399_vm0, %v2716_v40, 0  ;;  %v1238_v44 = vsel %vm399_vm0, %v2723_v42, 0 }
  0xce   : > { %v884_v14 = vpop.permute.xlu0 %883  ;;  %v886_v49 = vpop.permute.xlu1 %885  ;;  %1579 = vrot.lane.b32.xlu1 %v2856_v48, %s2534_s15 }
  0xcf   : > { %v889_v50 = vsel %vm473_vm4, %v884_v14, %v886_v49  ;;  %v890_v51 = vsel %vm473_vm4, %v886_v49, %v888_v24  ;;  %v1056_v3 = vpop.permute.xlu2 %1055  ;;  %1581 = vrot.lane.b32.xlu2 %v2890_v0, %s2534_s15 }
  0xd0   : > { %v892_v52 = vsel %vm399_vm0, %v889_v50, 0  ;;  %v895_v53 = vsel %vm399_vm0, %v890_v51, 0 }
  0xd1   : > { %904 = vmatpush.bf16.msrb.mxu2 %v892_v52  ;;  %917 = vmatpush.bf16.msrb.mxu3 %v895_v53 }
  0xd4   : > { %1518 = vrot.lane.b32.xlu0 %v2716_v40, %s2541_s22  ;;  %2415 = vmatmul.msk.bf16.vlgmr.msra.gmra.mxu0 %vm395_vm1, %v2871_v54 }
  0xd5   : > { %2416 = vmatmul.msk.bf16.vlgmr.msra.gmra.mxu1 %vm395_vm1, %v2871_v54  ;;  %2423 = vmatmul.msk.bf16.vlgmr.msrb.gmra.mxu2 %vm395_vm1, %v2753_v60 }
  0xd6   : > { %v968_v58 = vpop.permute.xlu0 %967  ;;  %2424 = vmatmul.msk.bf16.vlgmr.msrb.gmra.mxu3 %vm395_vm1, %v2753_v60  ;;  %v970_v59 = vpop.permute.xlu1 %969  ;;  %1520 = vrot.lane.b32.xlu1 %v2723_v42, %s2541_s22 }
  0xd7   : > { %v973_v62 = vsel %vm565_vm6, %v968_v58, %v970_v59  ;;  %v974_v63 = vsel %vm565_vm6, %v970_v59, %v972_v33  ;;  %v1014_v10 = vpop.permute.xlu2 %1013  ;;  %1522 = vrot.lane.b32.xlu2 %v2746_v57, %s2541_s22  ;;  %v465_v33 = vpop.f32.mrf.mxu3 }
  0xd8   : > { %v976_v1 = vsel %vm399_vm0, %v973_v62, 0  ;;  %v979_v2 = vsel %vm399_vm0, %v974_v63, 0 }
  0xd9   : > { %988 = vmatpush.bf16.msra.mxu2 %v976_v1  ;;  %1001 = vmatpush.bf16.msra.mxu3 %v979_v2 }
  0xdc   : > { %1649 = vrot.lane.b32.xlu0 %v2854_v47, %s2536_s17 }
  0xde   : > { %v926_v4 = vpop.permute.xlu0 %925  ;;  %v928_v5 = vpop.permute.xlu1 %927  ;;  %1651 = vrot.lane.b32.xlu1 %v2856_v48, %s2536_s17 }
  0xdf   : > { %v931_v6 = vsel %vm519_vm2, %v926_v4, %v928_v5  ;;  %v932_v7 = vsel %vm519_vm2, %v928_v5, %v930_v13  ;;  %1653 = vrot.lane.b32.xlu2 %v2890_v0, %s2536_s17  ;;  %v1140_v24 = vpop.permute.xlu2 %1139 }
  0xe0   : > { %v934_v8 = vsel %vm399_vm0, %v931_v6, 0  ;;  %v937_v9 = vsel %vm399_vm0, %v932_v7, 0  ;;  %v370_v6 = vld [vmem:[%s3274_s2] sm:$0xff] }
  0xe1   : > { %946 = vmatpush.bf16.msra.mxu0 %v934_v8  ;;  %959 = vmatpush.bf16.msra.mxu1 %v937_v9 }
  0xe4   : > { %1733 = vrot.lane.b32.xlu0 %v2854_v47, %s2538_s19  ;;  %2421 = vmatmul.msk.bf16.vlgmr.msrb.gmra.mxu0 %vm395_vm1, %v2669_v18 }
  0xe5   : > { %2422 = vmatmul.msk.bf16.vlgmr.msrb.gmra.mxu1 %vm395_vm1, %v2669_v18  ;;  %2427 = vmatmul.msk.bf16.vlgmr.msra.gmra.mxu2 %vm395_vm1, %v2791_v11 }
  0xe6   : > { %v1052_v12 = vpop.permute.xlu0 %1051  ;;  %2428 = vmatmul.msk.bf16.vlgmr.msra.gmra.mxu3 %vm395_vm1, %v2791_v11  ;;  %v1054_v16 = vpop.permute.xlu1 %1053  ;;  %1735 = vrot.lane.b32.xlu1 %v2856_v48, %s2538_s19 }
  0xe7   : > { %v1057_v57 = vsel %vm657_vm8, %v1052_v12, %v1054_v16  ;;  %v1058_v17 = vsel %vm657_vm8, %v1054_v16, %v1056_v3  ;;  %1737 = vrot.lane.b32.xlu2 %v2890_v0, %s2538_s19  ;;  %v1098_v34 = vpop.permute.xlu2 %1097  ;;  %s2550_s19 = smov 112  }
  0xe8   : > { %v1060_v19 = vsel %vm399_vm0, %v1057_v57, 0  ;;  %v1063_v20 = vsel %vm399_vm0, %v1058_v17, 0 }
  0xe9   : > { %1072 = vmatpush.bf16.msrb.mxu2 %v1060_v19  ;;  %1085 = vmatpush.bf16.msrb.mxu3 %v1063_v20 }
  0xec   : > { %1691 = vrot.lane.b32.xlu0 %v2854_v47, %s2535_s16 }
  0xee   : > { %v1010_v25 = vpop.permute.xlu0 %1009  ;;  %v1012_v26 = vpop.permute.xlu1 %1011  ;;  %1693 = vrot.lane.b32.xlu1 %v2856_v48, %s2535_s16 }
  0xef   : > { %v1015_v27 = vsel %vm611_vm5, %v1010_v25, %v1012_v26  ;;  %v1016_v28 = vsel %vm611_vm5, %v1012_v26, %v1014_v10  ;;  %1695 = vrot.lane.b32.xlu2 %v2890_v0, %s2535_s16 }
  0xf0   : > { %v1018_v29 = vsel %vm399_vm0, %v1015_v27, 0  ;;  %v1021_v30 = vsel %vm399_vm0, %v1016_v28, 0  ;;  %v1199_v13 = vpop.permute.xlu2 %1198 }
  0xf1   : > { %1030 = vmatpush.bf16.msrb.mxu0 %v1018_v29  ;;  %1043 = vmatpush.bf16.msrb.mxu1 %v1021_v30 }
  0xf4   : > { %1817 = vrot.lane.b32.xlu0 %v2854_v47, %s2540_s21  ;;  %2425 = vmatmul.msk.bf16.vlgmr.msra.gmra.mxu0 %vm395_vm1, %v2690_v23 }
  0xf5   : > { %2426 = vmatmul.msk.bf16.vlgmr.msra.gmra.mxu1 %vm395_vm1, %v2690_v23  ;;  %2431 = vmatmul.msk.bf16.vlgmr.msrb.gmra.mxu2 %vm395_vm1, %v2829_v31 }
  0xf6   : > { %v1136_v35 = vpop.permute.xlu0 %1135  ;;  %2432 = vmatmul.msk.bf16.vlgmr.msrb.gmra.mxu3 %vm395_vm1, %v2829_v31  ;;  %v1138_v36 = vpop.permute.xlu1 %1137  ;;  %1819 = vrot.lane.b32.xlu1 %v2856_v48, %s2540_s21 }
  0xf7   : > { %v1141_v37 = vsel %vm749_vm9, %v1136_v35, %v1138_v36  ;;  %v1142_v38 = vsel %vm749_vm9, %v1138_v36, %v1140_v24  ;;  %1821 = vrot.lane.b32.xlu2 %v2890_v0, %s2540_s21 }
  0xf8   : > { %v1144_v45 = vsel %vm399_vm0, %v1141_v37, 0  ;;  %v1147_v46 = vsel %vm399_vm0, %v1142_v38, 0  ;;  %v1313_v53 = vpop.permute.xlu2 %1312 }
  0xf9   : > { %1156 = vmatpush.bf16.msra.mxu2 %v1144_v45  ;;  %1169 = vmatpush.bf16.msra.mxu3 %v1147_v46 }
  0xfc   : > { %1775 = vrot.lane.b32.xlu0 %v2854_v47, %s2537_s18 }
  0xfd   : > { %1247 = vmatpush.bf16.msrb.mxu2 %v1235_v43  ;;  %1260 = vmatpush.bf16.msrb.mxu3 %v1238_v44 }
  0xfe   : > { %v1094_v40 = vpop.permute.xlu0 %1093  ;;  %v1096_v14 = vpop.permute.xlu1 %1095  ;;  %1777 = vrot.lane.b32.xlu1 %v2856_v48, %s2537_s18 }
  0xff   : > { %v1099_v42 = vsel %vm703_vm7, %v1094_v40, %v1096_v14  ;;  %v1100_v49 = vsel %vm703_vm7, %v1096_v14, %v1098_v34  ;;  %1779 = vrot.lane.b32.xlu2 %v2890_v0, %s2537_s18 }
 0x100   : > { %v1102_v50 = vsel %vm399_vm0, %v1099_v42, 0  ;;  %v1105_v51 = vsel %vm399_vm0, %v1100_v49, 0  ;;  %v2968_v52 = vpop.f32.mrf.mxu3 }
 0x101   : > { %1114 = vmatpush.bf16.msra.mxu0 %v1102_v50  ;;  %1127 = vmatpush.bf16.msra.mxu1 %v1105_v51  ;;  %v1271_v2 = vpop.permute.xlu2 %1270 }
 0x104   : > { %1901 = vrot.lane.b32.xlu0 %v2854_v47, %s2541_s22  ;;  %2429 = vmatmul.msk.bf16.vlgmr.msrb.gmra.mxu0 %vm395_vm1, %v2758_v61 }
 0x105   : > { %2430 = vmatmul.msk.bf16.vlgmr.msrb.gmra.mxu1 %vm395_vm1, %v2758_v61  ;;  %2435 = vmatmul.msk.bf16.vlgmr.msra.gmra.mxu2 %vm395_vm1, %v2871_v54 }
 0x106   : > { %v1195_v55 = vpop.permute.xlu0 %1194  ;;  %2436 = vmatmul.msk.bf16.vlgmr.msra.gmra.mxu3 %vm395_vm1, %v2871_v54  ;;  %1903 = vrot.lane.b32.xlu1 %v2856_v48, %s2541_s22 }
 0x107   : > { %1905 = vrot.lane.b32.xlu2 %v2890_v0, %s2541_s22 }
 0x108   : > { %v1197_v56 = vpop.permute.xlu1 %1196  ;;  %v555_v58 = vpop.f32.mrf.mxu3 }
 0x109   : > { %v1200_v59 = vsel %vm392_vm3, %v1195_v55, %v1197_v56  ;;  %v1201_v62 = vsel %vm392_vm3, %v1197_v56, %v1199_v13  ;;  %v1397_v17 = vpop.permute.xlu2 %1396 }
 0x10a   : > { %v1203_v63 = vsel %vm399_vm0, %v1200_v59, 0  ;;  %v1206_v1 = vsel %vm399_vm0, %v1201_v62, 0 }
 0x10b   : > { %1215 = vmatpush.bf16.msrb.mxu0 %v1203_v63  ;;  %1228 = vmatpush.bf16.msrb.mxu1 %v1206_v1 }
 0x10c   : > { %1859 = vrot.lane.b32.xlu0 %v2854_v47, %s2539_s20 }
 0x10e   : > { %v1309_v3 = vpop.permute.xlu0 %1308  ;;  %1861 = vrot.lane.b32.xlu1 %v2856_v48, %s2539_s20 }
 0x10f   : > { %1863 = vrot.lane.b32.xlu2 %v2890_v0, %s2539_s20 }
 0x110   : > { %v1311_v4 = vpop.permute.xlu1 %1310 }
 0x111   : > { %v415_v5 = vpop.f32.mrf.mxu0  ;;  %v1314_v7 = vsel %vm519_vm2, %v1309_v3, %v1311_v4  ;;  %v1315_v8 = vsel %vm519_vm2, %v1311_v4, %v1313_v53  ;;  %v1355_v29 = vpop.permute.xlu2 %1354 }
 0x112   : > { %v451_v9 = vadd.f32 %v2924_v21, %v415_v5  ;;  %v428_v10 = vpop.f32.mrf.mxu1  ;;  %v1317_v12 = vsel %vm399_vm0, %v1314_v7, 0  ;;  %v1320_v16 = vsel %vm399_vm0, %v1315_v8, 0 }
 0x113   : > { %v464_v57 = vadd.f32 %v2926_v22, %v428_v10  ;;  %1329 = vmatpush.bf16.msra.mxu2 %v1317_v12  ;;  %1342 = vmatpush.bf16.msra.mxu3 %v1320_v16 }
 0x114   : > { %791 = vperm.xlu0 %2521, %v370_v6   ;;  %2433 = vmatmul.msk.bf16.vlgmr.msra.gmra.mxu0 %vm395_vm1, %v2796_v15 }
 0x115   : > { %2434 = vmatmul.msk.bf16.vlgmr.msra.gmra.mxu1 %vm395_vm1, %v2796_v15  ;;  %2441 = vmatmul.msk.bf16.vlgmr.msrb.gmra.mxu2 %vm395_vm1, %v2669_v18 }
 0x116   : > { %v1267_v19 = vpop.permute.xlu0 %1266  ;;  %2442 = vmatmul.msk.bf16.vlgmr.msrb.gmra.mxu3 %vm395_vm1, %v2669_v18 }
 0x118   : > { %v540_v20 = vpop.f32.mrf.mxu2  ;;  %v1269_v21 = vpop.permute.xlu1 %1268 }
 0x119   : > { %v417_v22 = vpop.f32.mrf.mxu0  ;;  %v1272_v24 = vsel %vm473_vm4, %v1267_v19, %v1269_v21  ;;  %v1273_v25 = vsel %vm473_vm4, %v1269_v21, %v1271_v2  ;;  %v1481_v45 = vpop.permute.xlu2 %1480 }
 0x11a   : > { %v430_v26 = vpop.f32.mrf.mxu1  ;;  %v1275_v27 = vsel %vm399_vm0, %v1272_v24, 0  ;;  %v1278_v28 = vsel %vm399_vm0, %v1273_v25, 0 }
 0x11b   : > { %1287 = vmatpush.bf16.msra.mxu0 %v1275_v27  ;;  %1300 = vmatpush.bf16.msra.mxu1 %v1278_v28 }
 0x11e   : > { %v1393_v30 = vpop.permute.xlu0 %1392 }
 0x120   : > { %v542_v18 = vpop.f32.mrf.mxu2  ;;  %v1395_v32 = vpop.permute.xlu1 %1394 }
 0x121   : > { %v494_v33 = vpop.f32.mrf.mxu0  ;;  %v1398_v34 = vsel %vm611_vm5, %v1393_v30, %v1395_v32  ;;  %v1399_v35 = vsel %vm611_vm5, %v1395_v32, %v1397_v17 }
 0x122   : > { %v511_v36 = vadd.f32 %v494_v33, %v451_v9  ;;  %v507_v37 = vpop.f32.mrf.mxu1  ;;  %v1401_v38 = vsel %vm399_vm0, %v1398_v34, 0  ;;  %v1404_v39 = vsel %vm399_vm0, %v1399_v35, 0 }
 0x123   : > { %v512_v43 = vadd.f32 %v507_v37, %v464_v57  ;;  %1413 = vmatpush.bf16.msrb.mxu2 %v1401_v38  ;;  %1426 = vmatpush.bf16.msrb.mxu3 %v1404_v39 }
 0x124   : > { %2439 = vmatmul.msk.bf16.vlgmr.msrb.gmra.mxu0 %vm395_vm1, %v2721_v41  ;;  %v557_v0 = vadd.f32 %v540_v20, %v511_v36 }
 0x125   : > { %2440 = vmatmul.msk.bf16.vlgmr.msrb.gmra.mxu1 %vm395_vm1, %v2721_v41  ;;  %2445 = vmatmul.msk.bf16.vlgmr.msra.gmra.mxu2 %vm395_vm1, %v2690_v23  ;;  %v558_v44 = vadd.f32 %v2968_v52, %v512_v43  ;;  %v1439_v52 = vpop.permute.xlu2 %1438 }
 0x126   : > { %v1351_v46 = vpop.permute.xlu0 %1350  ;;  %2446 = vmatmul.msk.bf16.vlgmr.msra.gmra.mxu3 %vm395_vm1, %v2690_v23 }
 0x128   : > { %v632_v13 = vpop.f32.mrf.mxu2  ;;  %v1353_v40 = vpop.permute.xlu1 %1352 }
 0x129   : > { %v496_v14 = vpop.f32.mrf.mxu0  ;;  %v645_v42 = vpop.f32.mrf.mxu3  ;;  %v1356_v49 = vsel %vm565_vm6, %v1351_v46, %v1353_v40  ;;  %v1357_v50 = vsel %vm565_vm6, %v1353_v40, %v1355_v29 }
 0x12a   : > { %v509_v51 = vpop.f32.mrf.mxu1  ;;  %v1359_v53 = vsel %vm399_vm0, %v1356_v49, 0  ;;  %v1362_v55 = vsel %vm399_vm0, %v1357_v50, 0 }
 0x12b   : > { %1371 = vmatpush.bf16.msrb.mxu0 %v1359_v53  ;;  %1384 = vmatpush.bf16.msrb.mxu1 %v1362_v55 }
 0x12d   : > { %v1582_v9 = vpop.permute.xlu2 %1581 }
 0x12e   : > { %v1477_v56 = vpop.permute.xlu0 %1476 }
 0x130   : > { %v634_v58 = vpop.f32.mrf.mxu2  ;;  %v1479_v59 = vpop.permute.xlu1 %1478 }
 0x131   : > { %v586_v23 = vpop.f32.mrf.mxu0  ;;  %v647_v62 = vpop.f32.mrf.mxu3  ;;  %v1482_v63 = vsel %vm703_vm7, %v1477_v56, %v1479_v59  ;;  %v1483_v1 = vsel %vm703_vm7, %v1479_v59, %v1481_v45 }
 0x132   : > { %v603_v2 = vadd.f32 %v586_v23, %v557_v0  ;;  %v599_v3 = vpop.f32.mrf.mxu1  ;;  %v1485_v4 = vsel %vm399_vm0, %v1482_v63, 0  ;;  %v1488_v5 = vsel %vm399_vm0, %v1483_v1, 0 }
 0x133   : > { %v604_v6 = vadd.f32 %v599_v3, %v558_v44  ;;  %1497 = vmatpush.bf16.msra.mxu2 %v1485_v4  ;;  %1510 = vmatpush.bf16.msra.mxu3 %v1488_v5  ;;  %v1618_v3 = vsel %vm399_vm0, %v2854_v47, 0  ;;  %v1621_v5 = vsel %vm399_vm0, %v2856_v48, 0 }
 0x134   : > { %2443 = vmatmul.msk.bf16.vlgmr.msra.gmra.mxu0 %vm395_vm1, %v2753_v60  ;;  %v649_v7 = vadd.f32 %v632_v13, %v603_v2 }
 0x135   : > { %2444 = vmatmul.msk.bf16.vlgmr.msra.gmra.mxu1 %vm395_vm1, %v2753_v60  ;;  %2449 = vmatmul.msk.bf16.vlgmr.msrb.gmra.mxu2 %vm395_vm1, %v2758_v61  ;;  %v650_v8 = vadd.f32 %v645_v42, %v604_v6  ;;  %v1523_v26 = vpop.permute.xlu2 %1522 }
 0x136   : > { %v1435_v10 = vpop.permute.xlu0 %1434  ;;  %2450 = vmatmul.msk.bf16.vlgmr.msrb.gmra.mxu3 %vm395_vm1, %v2758_v61 }
 0x138   : > { %v724_v12 = vpop.f32.mrf.mxu2  ;;  %v1437_v16 = vpop.permute.xlu1 %1436 }
 0x139   : > { %v588_v57 = vpop.f32.mrf.mxu0  ;;  %v737_v17 = vpop.f32.mrf.mxu3  ;;  %v1440_v19 = vsel %vm657_vm8, %v1435_v10, %v1437_v16  ;;  %v1441_v20 = vsel %vm657_vm8, %v1437_v16, %v1439_v52 }
 0x13a   : > { %v601_v21 = vpop.f32.mrf.mxu1  ;;  %v1443_v22 = vsel %vm399_vm0, %v1440_v19, 0  ;;  %v1446_v24 = vsel %vm399_vm0, %v1441_v20, 0 }
 0x13b   : > { %1455 = vmatpush.bf16.msra.mxu0 %v1443_v22  ;;  %1468 = vmatpush.bf16.msra.mxu1 %v1446_v24 }
 0x13d   : > { %v1654_v50 = vpop.permute.xlu2 %1653 }
 0x13e   : > { %v1578_v25 = vpop.permute.xlu0 %1577 }
 0x140   : > { %v726_v27 = vpop.f32.mrf.mxu2  ;;  %v1580_v28 = vpop.permute.xlu1 %1579 }
 0x141   : > { %v678_v29 = vpop.f32.mrf.mxu0  ;;  %v739_v30 = vpop.f32.mrf.mxu3  ;;  %v1583_v18 = vsel %vm392_vm3, %v1578_v25, %v1580_v28  ;;  %v1584_v32 = vsel %vm392_vm3, %v1580_v28, %v1582_v9  ;;  %vm2311_vm3 = vcmask 392192  }
 0x142   : > { %v695_v33 = vadd.f32 %v678_v29, %v649_v7  ;;  %v691_v34 = vpop.f32.mrf.mxu1  ;;  %v1586_v35 = vsel %vm399_vm0, %v1583_v18, 0  ;;  %v1589_v36 = vsel %vm399_vm0, %v1584_v32, 0 }
 0x143   : > { %v696_v37 = vadd.f32 %v691_v34, %v650_v8  ;;  %1598 = vmatpush.bf16.msrb.mxu2 %v1586_v35  ;;  %1611 = vmatpush.bf16.msrb.mxu3 %v1589_v36 }
 0x144   : > { %2447 = vmatmul.msk.bf16.vlgmr.msrb.gmra.mxu0 %vm395_vm1, %v2791_v11  ;;  %v741_v38 = vadd.f32 %v724_v12, %v695_v33 }
 0x145   : > { %2448 = vmatmul.msk.bf16.vlgmr.msrb.gmra.mxu1 %vm395_vm1, %v2791_v11  ;;  %2453 = vmatmul.msk.bf16.vlgmr.msra.gmra.mxu2 %vm395_vm1, %v2796_v15  ;;  %v742_v39 = vadd.f32 %v737_v17, %v696_v37  ;;  %v1738_v4 = vpop.permute.xlu2 %1737 }
 0x146   : > { %v1519_v43 = vpop.permute.xlu0 %1518  ;;  %2454 = vmatmul.msk.bf16.vlgmr.msra.gmra.mxu3 %vm395_vm1, %v2796_v15 }
 0x148   : > { %v834_v0 = vpop.f32.mrf.mxu2  ;;  %v1521_v44 = vpop.permute.xlu1 %1520 }
 0x149   : > { %v680_v45 = vpop.f32.mrf.mxu0  ;;  %v847_v46 = vpop.f32.mrf.mxu3  ;;  %v1524_v13 = vsel %vm749_vm9, %v1519_v43, %v1521_v44  ;;  %v1525_v40 = vsel %vm749_vm9, %v1521_v44, %v1523_v26 }
 0x14a   : > { %v693_v14 = vpop.f32.mrf.mxu1  ;;  %v1527_v42 = vsel %vm399_vm0, %v1524_v13, 0  ;;  %v1530_v49 = vsel %vm399_vm0, %v1525_v40, 0 }
 0x14b   : > { %1539 = vmatpush.bf16.msrb.mxu0 %v1527_v42  ;;  %1552 = vmatpush.bf16.msrb.mxu1 %v1530_v49 }
 0x14d   : > { %v1696_v17 = vpop.permute.xlu2 %1695 }
 0x14e   : > { %v1650_v51 = vpop.permute.xlu0 %1649 }
 0x150   : > { %v836_v53 = vpop.f32.mrf.mxu2  ;;  %v1652_v55 = vpop.permute.xlu1 %1651 }
 0x151   : > { %v770_v52 = vpop.f32.mrf.mxu0  ;;  %v849_v56 = vpop.f32.mrf.mxu3  ;;  %v1655_v58 = vsel %vm473_vm4, %v1650_v51, %v1652_v55  ;;  %v1656_v59 = vsel %vm473_vm4, %v1652_v55, %v1654_v50  ;;  %vm2314_vm4 = vcmask 457728  }
 0x152   : > { %v3070_v23 = vadd.f32 %v770_v52, %v741_v38  ;;  %v783_v62 = vpop.f32.mrf.mxu1  ;;  %v1658_v63 = vsel %vm399_vm0, %v1655_v58, 0  ;;  %v1661_v1 = vsel %vm399_vm0, %v1656_v59, 0  ;;  %v2524_v56 = vld [vmem:[%s3273_s1] sm:$0xf] }
 0x153   : > { %v3074_v2 = vadd.f32 %v783_v62, %v742_v39  ;;  %1670 = vmatpush.bf16.msra.mxu2 %v1658_v63  ;;  %1683 = vmatpush.bf16.msra.mxu3 %v1661_v1 }
 0x154   : > { %2451 = vmatmul.msk.bf16.vlgmr.msra.gmra.mxu0 %vm395_vm1, %v2829_v31 }
 0x155   : > { %2452 = vmatmul.msk.bf16.vlgmr.msra.gmra.mxu1 %vm395_vm1, %v2829_v31  ;;  %2459 = vmatmul.msk.bf16.vlgmr.msrb.gmra.mxu2 %vm395_vm1, %v2721_v41  ;;  %v1822_v30 = vpop.permute.xlu2 %1821 }
 0x156   : > { %v1734_v6 = vpop.permute.xlu0 %1733  ;;  %2460 = vmatmul.msk.bf16.vlgmr.msrb.gmra.mxu3 %vm395_vm1, %v2721_v41  ;;  %1630 = vmatpush.bf16.msra.mxu0 %v1618_v3 }
 0x157   : > { %1643 = vmatpush.bf16.msra.mxu1 %v1621_v5 }
 0x158   : > { %v906_v47 = vpop.f32.mrf.mxu2  ;;  %v1736_v7 = vpop.permute.xlu1 %1735 }
 0x159   : > { %v772_v8 = vpop.f32.mrf.mxu0  ;;  %v919_v9 = vpop.f32.mrf.mxu3  ;;  %v1739_v10 = vsel %vm565_vm6, %v1734_v6, %v1736_v7  ;;  %v1740_v48 = vsel %vm565_vm6, %v1736_v7, %v1738_v4 }
 0x15a   : > { %v785_v12 = vpop.f32.mrf.mxu1  ;;  %v1742_v16 = vsel %vm399_vm0, %v1739_v10, 0  ;;  %v1745_v57 = vsel %vm399_vm0, %v1740_v48, 0 }
 0x15b   : > { %1754 = vmatpush.bf16.msrb.mxu2 %v1742_v16  ;;  %1767 = vmatpush.bf16.msrb.mxu3 %v1745_v57 }
 0x15e   : > { %v1692_v19 = vpop.permute.xlu0 %1691 }
 0x160   : > { %v908_v41 = vpop.f32.mrf.mxu2  ;;  %v1694_v20 = vpop.permute.xlu1 %1693 }
 0x161   : > { %v866_v21 = vpop.f32.mrf.mxu0  ;;  %v921_v22 = vpop.f32.mrf.mxu3  ;;  %v1697_v24 = vsel %vm519_vm2, %v1692_v19, %v1694_v20  ;;  %v1698_v25 = vsel %vm519_vm2, %v1694_v20, %v1696_v17  ;;  %vm2308_vm2 = vcmask 326656  }
 0x162   : > { %v867_v26 = vadd.f32 %v866_v21, %v834_v0  ;;  %v879_v27 = vpop.f32.mrf.mxu1  ;;  %v1700_v29 = vsel %vm399_vm0, %v1697_v24, 0  ;;  %v1703_v32 = vsel %vm399_vm0, %v1698_v25, 0  ;;  %v2525_v25 = vld [vmem:[%s3273_s1 + $0xc] sm:$0xf] }
 0x163   : > { %v880_v28 = vadd.f32 %v879_v27, %v847_v46  ;;  %v1780_v46 = vpop.permute.xlu2 %1779 }
 0x164   : > { %2455 = vmatmul.msk.bf16.vlgmr.msrb.gmra.mxu0 %vm395_vm1, %v2871_v54  ;;  %v923_v18 = vadd.f32 %v906_v47, %v867_v26 }
 0x165   : > { %2456 = vmatmul.msk.bf16.vlgmr.msrb.gmra.mxu1 %vm395_vm1, %v2871_v54  ;;  %2463 = vmatmul.msk.bf16.vlgmr.msra.gmra.mxu2 %vm395_vm1, %v2753_v60  ;;  %v924_v33 = vadd.f32 %v919_v9, %v880_v28 }
 0x166   : > { %v1818_v34 = vpop.permute.xlu0 %1817  ;;  %2464 = vmatmul.msk.bf16.vlgmr.msra.gmra.mxu3 %vm395_vm1, %v2753_v60  ;;  %1712 = vmatpush.bf16.msrb.mxu0 %v1700_v29 }
 0x167   : > { %1725 = vmatpush.bf16.msrb.mxu1 %v1703_v32 }
 0x168   : > { %v990_v35 = vpop.f32.mrf.mxu2  ;;  %v1820_v36 = vpop.permute.xlu1 %1819 }
 0x169   : > { %v868_v37 = vpop.f32.mrf.mxu0  ;;  %v1003_v38 = vpop.f32.mrf.mxu3  ;;  %v1823_v39 = vsel %vm657_vm8, %v1818_v34, %v1820_v36  ;;  %v1824_v43 = vsel %vm657_vm8, %v1820_v36, %v1822_v30 }
 0x16a   : > { %v881_v0 = vpop.f32.mrf.mxu1  ;;  %v1826_v44 = vsel %vm399_vm0, %v1823_v39, 0  ;;  %v1829_v45 = vsel %vm399_vm0, %v1824_v43, 0 }
 0x16b   : > { %1838 = vmatpush.bf16.msra.mxu2 %v1826_v44  ;;  %1851 = vmatpush.bf16.msra.mxu3 %v1829_v45  ;;  %v1906_v1 = vpop.permute.xlu2 %1905 }
 0x16e   : > { %v1776_v13 = vpop.permute.xlu0 %1775 }
 0x170   : > { %v992_v60 = vpop.f32.mrf.mxu2  ;;  %v1778_v40 = vpop.permute.xlu1 %1777 }
 0x171   : > { %v948_v14 = vpop.f32.mrf.mxu0  ;;  %v1005_v42 = vpop.f32.mrf.mxu3  ;;  %v1781_v49 = vsel %vm611_vm5, %v1776_v13, %v1778_v40  ;;  %v1782_v50 = vsel %vm611_vm5, %v1778_v40, %v1780_v46  ;;  %vm2317_vm5 = vcmask 523264  }
 0x172   : > { %v965_v51 = vadd.f32 %v948_v14, %v923_v18  ;;  %v961_v53 = vpop.f32.mrf.mxu1  ;;  %v1784_v52 = vsel %vm399_vm0, %v1781_v49, 0  ;;  %v1787_v59 = vsel %vm399_vm0, %v1782_v50, 0 }
 0x173   : > { %v966_v55 = vadd.f32 %v961_v53, %v924_v33  ;;  %v1864_v48 = vpop.permute.xlu2 %1863 }
 0x174   : > { %2461 = vmatmul.msk.bf16.vlgmr.msra.gmra.mxu0 %vm395_vm1, %v2524_v56  ;;  %v1007_v58 = vadd.f32 %v990_v35, %v965_v51 }
 0x175   : > { %2462 = vmatmul.msk.bf16.vlgmr.msra.gmra.mxu1 %vm395_vm1, %v2524_v56  ;;  %2467 = vmatmul.msk.bf16.vlgmr.msrb.gmra.mxu2 %vm395_vm1, %v2791_v11  ;;  %v1008_v62 = vadd.f32 %v1003_v38, %v966_v55 }
 0x176   : > { %v1902_v63 = vpop.permute.xlu0 %1901  ;;  %2468 = vmatmul.msk.bf16.vlgmr.msrb.gmra.mxu3 %vm395_vm1, %v2791_v11  ;;  %1796 = vmatpush.bf16.msra.mxu0 %v1784_v52 }
 0x177   : > { %1809 = vmatpush.bf16.msra.mxu1 %v1787_v59 }
 0x178   : > { %v1074_v3 = vpop.f32.mrf.mxu2  ;;  %v1904_v4 = vpop.permute.xlu1 %1903 }
 0x179   : > { %v950_v5 = vpop.f32.mrf.mxu0  ;;  %v1087_v6 = vpop.f32.mrf.mxu3  ;;  %v1907_v47 = vsel %vm749_vm9, %v1902_v63, %v1904_v4  ;;  %v1908_v7 = vsel %vm749_vm9, %v1904_v4, %v1906_v1 }
 0x17a   : > { %v963_v8 = vpop.f32.mrf.mxu1  ;;  %v1910_v9 = vsel %vm399_vm0, %v1907_v47, 0  ;;  %v1913_v10 = vsel %vm399_vm0, %v1908_v7, 0 }
 0x17b   : > { %1922 = vmatpush.bf16.msrb.mxu2 %v1910_v9  ;;  %1935 = vmatpush.bf16.msrb.mxu3 %v1913_v10 }
 0x17e   : > { %v1860_v11 = vpop.permute.xlu0 %1859 }
 0x180   : > { %v1076_v12 = vpop.f32.mrf.mxu2  ;;  %v1862_v16 = vpop.permute.xlu1 %1861 }
 0x181   : > { %v1032_v57 = vpop.f32.mrf.mxu0  ;;  %v1089_v17 = vpop.f32.mrf.mxu3  ;;  %v1865_v19 = vsel %vm703_vm7, %v1860_v11, %v1862_v16  ;;  %v1866_v41 = vsel %vm703_vm7, %v1862_v16, %v1864_v48 }
 0x182   : > { %v1049_v20 = vadd.f32 %v1032_v57, %v1007_v58  ;;  %v1045_v21 = vpop.f32.mrf.mxu1  ;;  %v1868_v24 = vsel %vm399_vm0, %v1865_v19, 0  ;;  %v1871_v27 = vsel %vm399_vm0, %v1866_v41, 0 }
 0x183   : > { %v1050_v22 = vadd.f32 %v1045_v21, %v1008_v62 }
 0x184   : > { %2465 = vmatmul.msk.bf16.vlgmr.msrb.gmra.mxu0 %vm395_vm1, %v2525_v25  ;;  %v1091_v26 = vadd.f32 %v1074_v3, %v1049_v20 }
 0x185   : > { %2466 = vmatmul.msk.bf16.vlgmr.msrb.gmra.mxu1 %vm395_vm1, %v2525_v25  ;;  %2471 = vmatmul.msk.bf16.vlgmr.msra.gmra.mxu2 %vm395_vm1, %v2829_v31  ;;  %v1092_v28 = vadd.f32 %v1087_v6, %v1050_v22 }
 0x186   : > { %2472 = vmatmul.msk.bf16.vlgmr.msra.gmra.mxu3 %vm395_vm1, %v2829_v31  ;;  %1880 = vmatpush.bf16.msrb.mxu0 %v1868_v24  ;;  %v3138_v33 = vpop.permute.xlu0 %791 }
 0x187   : > { %1893 = vmatpush.bf16.msrb.mxu1 %v1871_v27  ;;  %v794_v31 = vadd.f32 %v3138_v33, %v3070_v23  ;;  %v795_v44 = vadd.f32 %v3138_v33, %v3074_v2 }
 0x188   : > { %v1158_v29 = vpop.f32.mrf.mxu2 }
 0x189   : > { %v1034_v30 = vpop.f32.mrf.mxu0  ;;  %v1171_v18 = vpop.f32.mrf.mxu3  ;;  %v796_v23 = vmax.f32 %v794_v31, 0.0 }
 0x18a   : > { %v1047_v32 = vpop.f32.mrf.mxu1 }
 0x190   : > { %v1160_v34 = vpop.f32.mrf.mxu2 }
 0x191   : > { %v1116_v35 = vpop.f32.mrf.mxu0  ;;  %v1173_v36 = vpop.f32.mrf.mxu3 }
 0x192   : > { %v1133_v37 = vadd.f32 %v1116_v35, %v1091_v26  ;;  %v1129_v38 = vpop.f32.mrf.mxu1 }
 0x193   : > { %v1134_v39 = vadd.f32 %v1129_v38, %v1092_v28 }
 0x194   : > { %v1175_v43 = vadd.f32 %v1158_v29, %v1133_v37  ;;  %2469 = vmatmul.msk.bf16.vlgmr.msra.gmra.mxu0 %vm395_vm1, %v2758_v61 }
 0x195   : > { %v1176_v0 = vadd.f32 %v1171_v18, %v1134_v39  ;;  %2470 = vmatmul.msk.bf16.vlgmr.msra.gmra.mxu1 %vm395_vm1, %v2758_v61  ;;  %2475 = vmatmul.msk.bf16.vlgmr.msrb.gmra.mxu2 %vm395_vm1, %v2871_v54  ;;  %v797_v61 = vmax.f32 %v795_v44, 0.0 }
 0x196   : > { %v1177_v45 = vadd.f32 %v1175_v43, %v3138_v33  ;;  %2476 = vmatmul.msk.bf16.vlgmr.msrb.gmra.mxu3 %vm395_vm1, %v2871_v54 }
 0x197   : > { %v1178_v46 = vadd.f32 %v1176_v0, %v3138_v33 }
 0x198   : > { %v1179_v13 = vmax.f32 %v1177_v45, 0.0  ;;  %v1249_v60 = vpop.f32.mrf.mxu2 }
 0x199   : > { %v1180_v40 = vmax.f32 %v1178_v46, 0.0  ;;  %v1118_v14 = vpop.f32.mrf.mxu0  ;;  %v1262_v42 = vpop.f32.mrf.mxu3 }
 0x19a   : > { %v1131_v49 = vpop.f32.mrf.mxu1  ;;  %v1181_v50 = vadd.f32 %v1179_v13, %v796_v23 }
 0x19b   : > { %v1182_v51 = vadd.f32 %v1180_v40, %v797_v61 }
 0x1a0   : > { %v1251_v53 = vpop.f32.mrf.mxu2 }
 0x1a1   : > { %v1217_v55 = vpop.f32.mrf.mxu0  ;;  %v1264_v2 = vpop.f32.mrf.mxu3 }
 0x1a2   : > { %v1250_v52 = vadd.f32 %v1249_v60, %v1217_v55  ;;  %v1230_v56 = vpop.f32.mrf.mxu1 }
 0x1a3   : > { %v1263_v58 = vadd.f32 %v1262_v42, %v1230_v56 }
 0x1a4   : > { %2473 = vmatmul.msk.bf16.vlgmr.msrb.gmra.mxu0 %vm395_vm1, %v2796_v15 }
 0x1a5   : > { %2474 = vmatmul.msk.bf16.vlgmr.msrb.gmra.mxu1 %vm395_vm1, %v2796_v15 }
 0x1a8   : > { %v1331_v54 = vpop.f32.mrf.mxu2 }
 0x1a9   : > { %v1219_v59 = vpop.f32.mrf.mxu0  ;;  %v1344_v62 = vpop.f32.mrf.mxu3 }
 0x1aa   : > { %v1232_v63 = vpop.f32.mrf.mxu1 }
 0x1b0   : > { %v1333_v1 = vpop.f32.mrf.mxu2 }
 0x1b1   : > { %v1289_v3 = vpop.f32.mrf.mxu0  ;;  %v1346_v4 = vpop.f32.mrf.mxu3 }
 0x1b2   : > { %v1306_v5 = vadd.f32 %v1289_v3, %v1250_v52  ;;  %v1302_v6 = vpop.f32.mrf.mxu1 }
 0x1b3   : > { %v1307_v47 = vadd.f32 %v1302_v6, %v1263_v58 }
 0x1b4   : > { %v1348_v7 = vadd.f32 %v1331_v54, %v1306_v5 }
 0x1b5   : > { %v1349_v8 = vadd.f32 %v1344_v62, %v1307_v47 }
 0x1b8   : > { %v1415_v9 = vpop.f32.mrf.mxu2 }
 0x1b9   : > { %v1291_v10 = vpop.f32.mrf.mxu0  ;;  %v1428_v48 = vpop.f32.mrf.mxu3 }
 0x1ba   : > { %v1304_v11 = vpop.f32.mrf.mxu1 }
 0x1c0   : > { %v1417_v12 = vpop.f32.mrf.mxu2 }
 0x1c1   : > { %v1373_v16 = vpop.f32.mrf.mxu0  ;;  %v1430_v57 = vpop.f32.mrf.mxu3 }
 0x1c2   : > { %v1390_v15 = vadd.f32 %v1373_v16, %v1348_v7  ;;  %v1386_v17 = vpop.f32.mrf.mxu1 }
 0x1c3   : > { %v1391_v19 = vadd.f32 %v1386_v17, %v1349_v8 }
 0x1c4   : > { %v1432_v41 = vadd.f32 %v1415_v9, %v1390_v15 }
 0x1c5   : > { %v1433_v20 = vadd.f32 %v1428_v48, %v1391_v19 }
 0x1c8   : > { %v1499_v21 = vpop.f32.mrf.mxu2 }
 0x1c9   : > { %v1375_v22 = vpop.f32.mrf.mxu0  ;;  %v1512_v24 = vpop.f32.mrf.mxu3 }
 0x1ca   : > { %v1388_v25 = vpop.f32.mrf.mxu1 }
 0x1d0   : > { %v1501_v26 = vpop.f32.mrf.mxu2 }
 0x1d1   : > { %v1457_v27 = vpop.f32.mrf.mxu0  ;;  %v1514_v28 = vpop.f32.mrf.mxu3 }
 0x1d2   : > { %v1474_v29 = vadd.f32 %v1457_v27, %v1432_v41  ;;  %v1470_v30 = vpop.f32.mrf.mxu1 }
 0x1d3   : > { %v1475_v18 = vadd.f32 %v1470_v30, %v1433_v20 }
 0x1d4   : > { %v1516_v32 = vadd.f32 %v1499_v21, %v1474_v29 }
 0x1d5   : > { %v1517_v34 = vadd.f32 %v1512_v24, %v1475_v18 }
 0x1d8   : > { %v1600_v35 = vpop.f32.mrf.mxu2 }
 0x1d9   : > { %v1459_v36 = vpop.f32.mrf.mxu0  ;;  %v1613_v37 = vpop.f32.mrf.mxu3 }
 0x1da   : > { %v1472_v38 = vpop.f32.mrf.mxu1 }
 0x1e0   : > { %v1602_v39 = vpop.f32.mrf.mxu2 }
 0x1e1   : > { %v1541_v43 = vpop.f32.mrf.mxu0  ;;  %v1615_v31 = vpop.f32.mrf.mxu3 }
 0x1e2   : > { %v1558_v0 = vadd.f32 %v1541_v43, %v1516_v32  ;;  %v1554_v44 = vpop.f32.mrf.mxu1 }
 0x1e3   : > { %v1559_v45 = vadd.f32 %v1554_v44, %v1517_v34 }
 0x1e4   : > { %v1560_v46 = vadd.f32 %v1558_v0, %v3138_v33 }
 0x1e5   : > { %v1561_v13 = vadd.f32 %v1559_v45, %v3138_v33 }
 0x1e6   : > { %v1562_v60 = vmax.f32 %v1560_v46, 0.0 }
 0x1e7   : > { %v1563_v23 = vmax.f32 %v1561_v13, 0.0 }
 0x1e8   : > { %v1564_v40 = vadd.f32 %v1562_v60, %v1181_v50  ;;  %v1672_v14 = vpop.f32.mrf.mxu2 }
 0x1e9   : > { %v1565_v42 = vadd.f32 %v1563_v23, %v1182_v51  ;;  %v1543_v61 = vpop.f32.mrf.mxu0  ;;  %v1685_v49 = vpop.f32.mrf.mxu3 }
 0x1ea   : > { %v1556_v53 = vpop.f32.mrf.mxu1 }
 0x1f0   : > { %v1674_v55 = vpop.f32.mrf.mxu2 }
 0x1f1   : > { %v1632_v2 = vpop.f32.mrf.mxu0  ;;  %v1687_v52 = vpop.f32.mrf.mxu3 }
 0x1f2   : > { %v1645_v56 = vpop.f32.mrf.mxu1  ;;  %v1633_v51 = vadd.f32 %v1632_v2, %v1600_v35 }
 0x1f3   : > { %v1646_v8 = vadd.f32 %v1645_v56, %v1613_v37  ;;  %v374_v37 = vld [vmem:[%s3275_s3] sm:$0x3] }
 0x1f4   : > { %v1689_v11 = vadd.f32 %v1672_v14, %v1633_v51  ;;  %v1952_v44 = vperm.slane %v374_v37, 0  ;;  %v1953_v13 = vperm.slane %v374_v37, 1 }
 0x1f5   : > { %v1690_v12 = vadd.f32 %v1685_v49, %v1646_v8  ;;  %v371_v8 = vld [vmem:[%s3277_s5] sm:$0xff] }
 0x1f8   : > { %v1756_v58 = vpop.f32.mrf.mxu2 }
 0x1f9   : > { %v1634_v54 = vpop.f32.mrf.mxu0  ;;  %v1769_v59 = vpop.f32.mrf.mxu3 }
 0x1fa   : > { %v1647_v62 = vpop.f32.mrf.mxu1 }
 0x1fb   : > { %v351_v62 = vld [vmem:[%s3276_s4] sm:$0xf] }
 0x200   : > { %v1758_v63 = vpop.f32.mrf.mxu2 }
 0x201   : > { %v1714_v1 = vpop.f32.mrf.mxu0  ;;  %v1771_v3 = vpop.f32.mrf.mxu3 }
 0x202   : > { %v1727_v4 = vpop.f32.mrf.mxu1  ;;  %v1731_v16 = vadd.f32 %v1714_v1, %v1689_v11 }
 0x203   : > { %v1732_v57 = vadd.f32 %v1727_v4, %v1690_v12 }
 0x204   : > { %v1773_v41 = vadd.f32 %v1756_v58, %v1731_v16  ;;  %v2393_v16 = vld [vmem:[%s3276_s4 + $0xc] sm:$0xf] }
 0x205   : > { %v1774_v21 = vadd.f32 %v1769_v59, %v1732_v57  ;;  %v2392_v59 = vld [vmem:[%s3276_s4 + $0x8] sm:$0xf] }
 0x208   : > { %v1840_v5 = vpop.f32.mrf.mxu2 }
 0x209   : > { %v1716_v6 = vpop.f32.mrf.mxu0  ;;  %v1853_v50 = vpop.f32.mrf.mxu3 }
 0x20a   : > { %v1729_v47 = vpop.f32.mrf.mxu1 }
 0x210   : > { %v1842_v7 = vpop.f32.mrf.mxu2 }
 0x211   : > { %v1798_v9 = vpop.f32.mrf.mxu0  ;;  %v1855_v10 = vpop.f32.mrf.mxu3  ;;  %v2396_v7 = vld [vmem:[%s3276_s4 + $0x18] sm:$0xf] }
 0x212   : > { %v1811_v48 = vpop.f32.mrf.mxu1  ;;  %v1815_v22 = vadd.f32 %v1798_v9, %v1773_v41 }
 0x213   : > { %v1816_v24 = vadd.f32 %v1811_v48, %v1774_v21  ;;  %v2394_v21 = vld [vmem:[%s3276_s4 + $0x10] sm:$0xf] }
 0x214   : > { %v1857_v25 = vadd.f32 %v1840_v5, %v1815_v22 }
 0x215   : > { %v1858_v28 = vadd.f32 %v1853_v50, %v1816_v24  ;;  %v2391_v50 = vld [vmem:[%s3276_s4 + $0x4] sm:$0xf] }
 0x218   : > { %v1924_v15 = vpop.f32.mrf.mxu2 }
 0x219   : > { %v1800_v17 = vpop.f32.mrf.mxu0  ;;  %v1937_v19 = vpop.f32.mrf.mxu3 }
 0x21a   : > { %v1813_v20 = vpop.f32.mrf.mxu1 }
 0x220   : > { %v1926_v26 = vpop.f32.mrf.mxu2 }
 0x221   : > { %v1882_v27 = vpop.f32.mrf.mxu0  ;;  %v1939_v29 = vpop.f32.mrf.mxu3 }
 0x222   : > { %v1899_v30 = vadd.f32 %v1882_v27, %v1857_v25  ;;  %v1895_v18 = vpop.f32.mrf.mxu1  ;;  %v2397_v27 = vld [vmem:[%s3276_s4 + $0x1c] sm:$0xf] }
 0x223   : > { %v1900_v32 = vadd.f32 %v1895_v18, %v1858_v28  ;;  %v2395_v18 = vld [vmem:[%s3276_s4 + $0x14] sm:$0xf] }
 0x224   : > { %v1941_v34 = vadd.f32 %v1924_v15, %v1899_v30 }
 0x225   : > { %v1942_v35 = vadd.f32 %v1937_v19, %v1900_v32  ;;  %v2398_v32 = vld [vmem:[%s3276_s4 + $0x20] sm:$0xf] }
 0x226   : > { %v1943_v36 = vadd.f32 %v1941_v34, %v3138_v33 }
 0x227   : > { %v1944_v38 = vadd.f32 %v1942_v35, %v3138_v33 }
 0x228   : > { %v1945_v39 = vmax.f32 %v1943_v36, 0.0 }
 0x229   : > { %v1946_v43 = vmax.f32 %v1944_v38, 0.0  ;;  %v1884_v31 = vpop.f32.mrf.mxu0 }
 0x22a   : > { %v1947_v0 = vadd.f32 %v1945_v39, %v1564_v40  ;;  %v1897_v45 = vpop.f32.mrf.mxu1 }
 0x22b   : > { %v1948_v46 = vadd.f32 %v1946_v43, %v1565_v42 }
 0x22c   : > { %v1949_v60 = vmul.f32 0.25, %v1947_v0 }
 0x22d   : > { %v1950_v23 = vmul.f32 0.25, %v1948_v46 }
 0x22e   : > { %v1956_v14 = vmul.f32 %v1952_v44, %v1949_v60 }
 0x22f   : > { %v1957_v61 = vmul.f32 %v1953_v13, %v1950_v23 }
 0x231   : > { %v1958_v49 = vpack.c.bf16 %v1957_v61, %v1956_v14 }
 0x233   : > { %1959 = vst [vmem:[#allocation2] sm:$0xff] %v1958_v49  ;;  %v2028_v53 = vunpack.c.l.b16 %v1958_v49  ;;  %v2029_v33 = vunpack.c.h.b16 %v1958_v49 }
 0x235   : > { %v2030_v55 = vpack.c.b16 %v2028_v53, %v2028_v53  ;;  %v2031_v58 = vpack.c.b16 %v2029_v33, %v2029_v33 }
 0x237   : > { %2057 = vrot.lane.b32.xlu0 %v2030_v55, %s2541_s22 }
 0x23a   : > { %v1960_v2 = vld [vmem:[#allocation2] sm:$0xf] }
 0x23b   : > { %v1989_v52 = vsel %vm399_vm0, %v1960_v2, 0  ;;  %v1962_v56 = vunpack.c.l.b16 %v1960_v2 }
 0x23c   : > { %1998 = vmatpush.bf16.msra.mxu1 %v1989_v52 }
 0x23d   : > { %v1963_v40 = vpack.c.b16 %v1962_v56, %v1962_v56 }
 0x23f   : > { %2004 = vrot.lane.b32.xlu2 %v1963_v40, %s2543_s25  ;;  %1964 = vrot.lane.b32.xlu1 %v1963_v40, %s2536_s17 }
 0x240   : > { %2110 = vrot.lane.b32.xlu0 %v2031_v58, %s2544_s26  ;;  %2478 = vmatmul.msk.bf16.vlgmr.msra.gmra.mxu1 %vm395_vm1, %v351_v62 }
 0x247   : > { %2034 = vrot.lane.b32.xlu2 %v2031_v58, %s2540_s21  ;;  %2032 = vrot.lane.b32.xlu1 %v2030_v55, %s2540_s21 }
 0x248   : > { %2082 = vrot.lane.b32.xlu0 %v2030_v55, %s2545_s27 }
 0x24f   : > { %2108 = vrot.lane.b32.xlu2 %v2030_v55, %s2544_s26  ;;  %2059 = vrot.lane.b32.xlu1 %v2031_v58, %s2541_s22 }
 0x250   : > { %2162 = vrot.lane.b32.xlu0 %v2031_v58, %s2546_s28 }
 0x257   : > { %2136 = vrot.lane.b32.xlu2 %v2031_v58, %s2547_s29  ;;  %2134 = vrot.lane.b32.xlu1 %v2030_v55, %s2547_s29 }
 0x25f   : > { %2160 = vrot.lane.b32.xlu2 %v2030_v55, %s2546_s28  ;;  %2084 = vrot.lane.b32.xlu1 %v2031_v58, %s2545_s27 }
 0x267   : > { %2188 = vperm.xlu1 %2522, %v371_v8  }
 0x299   : > { %v2005_v42 = vpop.permute.xlu2 %2004 }
 0x29a   : > { %v2010_v54 = vsel %vm399_vm0, %v2005_v42, 0 }
 0x29b   : > { %2019 = vmatpush.bf16.msra.mxu2 %v2010_v54  ;;  %v2523_v54 = vld [vmem:[%s3278_s6] ss:$0 sm:$0xff] }
 0x29e   : > { %2479 = vmatmul.msk.bf16.vlgmr.msra.gmra.mxu2 %vm395_vm1, %v2392_v59 }
 0x2a1   : > { %v2035_v63 = vpop.permute.xlu2 %2034 }
 0x2a9   : > { %v2058_v1 = vpop.permute.xlu0 %2057  ;;  %v2109_v3 = vpop.permute.xlu2 %2108 }
 0x2b1   : > { %v1965_v4 = vpop.permute.xlu1 %1964  ;;  %v2137_v9 = vpop.permute.xlu2 %2136 }
 0x2b2   : > { %v1970_v5 = vsel %vm399_vm0, %v1965_v4, 0  ;;  %v2111_v6 = vpop.permute.xlu0 %2110 }
 0x2b3   : > { %1979 = vmatpush.bf16.msra.mxu0 %v1970_v5  ;;  %v2113_v47 = vsel %vm2112_vm10, %v2109_v3, %v2111_v6 }
 0x2b4   : > { %v2118_v51 = vsel %vm399_vm0, %v2113_v47, 0 }
 0x2b5   : > { %2127 = vmatpush.bf16.msrb.mxu2 %v2118_v51 }
 0x2b6   : > { %2477 = vmatmul.msk.bf16.vlgmr.msra.gmra.mxu0 %vm395_vm1, %v2391_v50  ;;  %v373_v50 = vld [vmem:[%s3280_s8 + $0x8] sm:$0xff] }
 0x2b8   : > { %2483 = vmatmul.msk.bf16.vlgmr.msrb.gmra.mxu2 %vm395_vm1, %v2396_v7 }
 0x2b9   : > { %v2033_v10 = vpop.permute.xlu1 %2032  ;;  %v2161_v15 = vpop.permute.xlu2 %2160 }
 0x2ba   : > { %v2036_v48 = vsel %vm657_vm8, %v2033_v10, %v2035_v63  ;;  %v2083_v11 = vpop.permute.xlu0 %2082 }
 0x2bb   : > { %v2041_v12 = vsel %vm399_vm0, %v2036_v48, 0  ;;  %v2494_v48 = vld [vmem:[%s3279_s7] sm:$0xff] }
 0x2bc   : > { %2050 = vmatpush.bf16.msra.mxu3 %v2041_v12 }
 0x2bd   : > { %v2000_v34 = vpop.f32.mrf.mxu1 }
 0x2bf   : > { %2480 = vmatmul.msk.bf16.vlgmr.msra.gmra.mxu3 %vm395_vm1, %v2393_v16 }
 0x2c1   : > { %v2060_v57 = vpop.permute.xlu1 %2059 }
 0x2c2   : > { %v2061_v17 = vsel %vm749_vm9, %v2058_v1, %v2060_v57  ;;  %v2163_v19 = vpop.permute.xlu0 %2162  ;;  %v372_v1 = vld [vmem:[%s3280_s8] sm:$0xff] }
 0x2c3   : > { %v2066_v41 = vsel %vm399_vm0, %v2061_v17, 0  ;;  %v2165_v20 = vsel %vm2164_vm11, %v2161_v15, %v2163_v19 }
 0x2c4   : > { %2075 = vmatpush.bf16.msrb.mxu0 %v2066_v41  ;;  %v2170_v22 = vsel %vm399_vm0, %v2165_v20, 0 }
 0x2c5   : > { %v2002_v36 = vpop.f32.mrf.mxu1 }
 0x2c7   : > { %2481 = vmatmul.msk.bf16.vlgmr.msrb.gmra.mxu0 %vm395_vm1, %v2394_v21 }
 0x2c8   : > { %2179 = vmatpush.bf16.msra.mxu0 %v2170_v22 }
 0x2c9   : > { %v2135_v24 = vpop.permute.xlu1 %2134 }
 0x2ca   : > { %v2139_v25 = vsel %vm2138_vm12, %v2135_v24, %v2137_v9 }
 0x2cb   : > { %v2144_v26 = vsel %vm399_vm0, %v2139_v25, 0 }
 0x2cc   : > { %2153 = vmatpush.bf16.msrb.mxu3 %v2144_v26 }
 0x2cf   : > { %2484 = vmatmul.msk.bf16.vlgmr.msrb.gmra.mxu3 %vm395_vm1, %v2397_v27 }
 0x2d1   : > { %v2085_v28 = vpop.permute.xlu1 %2084 }
 0x2d2   : > { %v2087_v29 = vsel %vm2086_vm13, %v2083_v11, %v2085_v28 }
 0x2d3   : > { %v2092_v30 = vsel %vm399_vm0, %v2087_v29, 0 }
 0x2d4   : > { %2101 = vmatpush.bf16.msrb.mxu1 %v2092_v30 }
 0x2d7   : > { %2482 = vmatmul.msk.bf16.vlgmr.msrb.gmra.mxu1 %vm395_vm1, %v2395_v18  ;;  %2485 = vmatmul.msk.bf16.vlgmr.msra.gmra.mxu0 %vm395_vm1, %v2398_v32 }
 0x2d9   : > { %v2189_v56 = vpop.permute.xlu1 %2188 }
 0x321   : > { %v2021_v35 = vpop.f32.mrf.mxu2 }
 0x329   : > { %v2023_v37 = vpop.f32.mrf.mxu2 }
 0x333   : > { %v1981_v38 = vpop.f32.mrf.mxu0 }
 0x334   : > { %v2001_v45 = vadd.f32 %v2000_v34, %v1981_v38 }
 0x336   : > { %v2025_v60 = vadd.f32 %v2021_v35, %v2001_v45 }
 0x33b   : > { %v1983_v39 = vpop.f32.mrf.mxu0  ;;  %v2129_v43 = vpop.f32.mrf.mxu2 }
 0x342   : > { %v2052_v31 = vpop.f32.mrf.mxu3 }
 0x343   : > { %v2131_v0 = vpop.f32.mrf.mxu2  ;;  %v2056_v23 = vadd.f32 %v2052_v31, %v2025_v60 }
 0x344   : > { %v2077_v44 = vpop.f32.mrf.mxu0 }
 0x345   : > { %v2081_v61 = vadd.f32 %v2077_v44, %v2056_v23 }
 0x34a   : > { %v2054_v46 = vpop.f32.mrf.mxu3 }
 0x34c   : > { %v2079_v13 = vpop.f32.mrf.mxu0 }
 0x352   : > { %v2155_v14 = vpop.f32.mrf.mxu3 }
 0x354   : > { %v2103_v49 = vpop.f32.mrf.mxu1  ;;  %v2181_v53 = vpop.f32.mrf.mxu0 }
 0x355   : > { %v2107_v55 = vadd.f32 %v2103_v49, %v2081_v61 }
 0x357   : > { %v2133_v2 = vadd.f32 %v2129_v43, %v2107_v55 }
 0x359   : > { %v2159_v33 = vadd.f32 %v2155_v14, %v2133_v2 }
 0x35a   : > { %v2157_v52 = vpop.f32.mrf.mxu3 }
 0x35b   : > { %v2185_v40 = vadd.f32 %v2181_v53, %v2159_v33 }
 0x35c   : > { %v2105_v58 = vpop.f32.mrf.mxu1  ;;  %v2183_v42 = vpop.f32.mrf.mxu0 }
 0x35d   : > { %v2191_v59 = vadd.f32 %v2189_v56, %v2185_v40 }
 0x35f   : > { %v2192_v62 = vmax.f32 %v2191_v59, 0.0 }
 0x361   : > { %v2196_v63 = vmul.f32 %v2523_v54, %v2192_v62 }
 0x363   : > { %2202 = vrot.lane.b32.xlu0 %v2196_v63, %s2536_s17  ;;  %2198 = vrot.lane.b32.xlu2 %v2196_v63, %s2534_s15 }
 0x36b   : > { %2218 = vperm.xlu0 %2521, %v372_v1  }
 0x3bd   : > { %v2199_v3 = vpop.permute.xlu2 %2198 }
 0x3be   : > { %v2201_v4 = vmax.f32 %v2196_v63, %v2199_v3 }
 0x3d5   : > { %v2203_v5 = vpop.permute.xlu0 %2202 }
 0x3d6   : > { %v2205_v6 = vmax.f32 %v2201_v4, %v2203_v5 }
 0x3d8   : > { %2211 = vrot.lane.b32.xlu2 %v2205_v6, %s2540_s21  ;;  %2207 = vrot.lane.b32.xlu1 %v2205_v6, %s2535_s16 }
 0x3dd   : > { %v2219_v11 = vpop.permute.xlu0 %2218 }
 0x3e0   : > { %2223 = vperm.xlu1 %2522, %v373_v50  }
 0x432   : > { %v2212_v7 = vpop.permute.xlu2 %2211 }
 0x44a   : > { %v2208_v47 = vpop.permute.xlu1 %2207 }
 0x44b   : > { %v2210_v51 = vmax.f32 %v2205_v6, %v2208_v47 }
 0x44d   : > { %v2214_v8 = vmax.f32 %v2210_v51, %v2212_v7 }
 0x44f   : > { %v2215_v9 = vpack.c.bf16 %v2214_v8, %v2214_v8 }
 0x451   : > { %v2235_v10 = vsel %vm399_vm0, %v2215_v9, 0  ;;  %vm2305_vm0 = vcmask 261120  }
 0x452   : > { %2244 = vmatpush.bf16.msra.mxu1 %v2235_v10  ;;  %v2224_v17 = vpop.permute.xlu1 %2223 }
 0x455   : > { %2490 = vmatmul.msk.bf16.vlgmr.msra.gmra.mxu1 %vm395_vm1, %v2494_v48 }
 0x4d2   : > { %v2246_v12 = vpop.f32.mrf.mxu1 }
 0x4d3   : > { %v2247_v16 = vadd.f32 %v2246_v12, %v2219_v11 }
 0x4d5   : > { %v2251_v57 = vmax.f32 %v2247_v16, 0.0 }
 0x4d7   : > { %2267 = vrot.lane.b32.xlu0 %v2251_v57, %s2535_s16  ;;  %2261 = vrot.lane.b32.xlu1 %v2251_v57, %s2548_s11 }
 0x4d8   : > { %2255 = vrot.lane.b32.xlu2 %v2251_v57, %s2543_s25 }
 0x4da   : > { %v2248_v15 = vpop.f32.mrf.mxu1 }
 0x4db   : > { %v2249_v19 = vadd.f32 %v2248_v15, %v2224_v17 }
 0x4dd   : > { %v2252_v41 = vmax.f32 %v2249_v19, 0.0 }
 0x4df   : > { %2285 = vrot.lane.b32.xlu0 %v2251_v57, %s2540_s21  ;;  %2279 = vrot.lane.b32.xlu1 %v2251_v57, %s2549_s14 }
 0x4e0   : > { %2273 = vrot.lane.b32.xlu2 %v2251_v57, %s2550_s19 }
 0x4e7   : > { %2269 = vrot.lane.b32.xlu1 %v2252_v41, %s2535_s16  ;;  %2257 = vrot.lane.b32.xlu0 %v2252_v41, %s2543_s25  ;;  %s2493_s16 = sshll.u32 %s3283_s10, 4 }
 0x4e8   : > { %2263 = vrot.lane.b32.xlu2 %v2252_v41, %s2548_s11 }
 0x4ef   : > { %2287 = vrot.lane.b32.xlu1 %v2252_v41, %s2540_s21  ;;  %2275 = vrot.lane.b32.xlu0 %v2252_v41, %s2550_s19 }
 0x4f0   : > { %2281 = vrot.lane.b32.xlu2 %v2252_v41, %s2549_s14 }
 0x4f7   : > { %2293 = vrot.lane.b32.xlu0 %v2252_v41, %s2545_s27 }
 0x4f8   : > { %2291 = vrot.lane.b32.xlu2 %v2251_v57, %s2545_s27  ;;  %s332_s27 = scalar_lea.vmem %s3281_s9, %s2493_s16 }
 0x532   : > { %v2256_v20 = vpop.permute.xlu2 %2255 }
 0x533   : > { %v2297_v26 = vsel %vm395_vm1, %v2251_v57, %v2256_v20 }
 0x53a   : > { %v2274_v21 = vpop.permute.xlu2 %2273 }
 0x542   : > { %v2264_v22 = vpop.permute.xlu2 %2263 }
 0x549   : > { %v2268_v24 = vpop.permute.xlu0 %2267  ;;  %v2262_v25 = vpop.permute.xlu1 %2261 }
 0x54a   : > { %v2282_v27 = vpop.permute.xlu2 %2281  ;;  %v2300_v28 = vsel %vm2299_vm14, %v2297_v26, %v2262_v25 }
 0x54b   : > { %v2303_v29 = vsel %vm2302_vm15, %v2300_v28, %v2268_v24 }
 0x54c   : > { %v2306_v18 = vsel %vm2305_vm0, %v2303_v29, %v2274_v21 }
 0x551   : > { %v2286_v30 = vpop.permute.xlu0 %2285  ;;  %v2280_v32 = vpop.permute.xlu1 %2279 }
 0x552   : > { %v2309_v34 = vsel %vm2308_vm2, %v2306_v18, %v2280_v32  ;;  %v2292_v35 = vpop.permute.xlu2 %2291 }
 0x553   : > { %v2312_v36 = vsel %vm2311_vm3, %v2309_v34, %v2286_v30 }
 0x554   : > { %v2315_v37 = vsel %vm2314_vm4, %v2312_v36, %v2292_v35 }
 0x555   : > { %2318 = vst.msk [vmem:[%s332_s27] sm:$0xff] %vm2317_vm5, %v2315_v37 }
 0x559   : > { %v2258_v38 = vpop.permute.xlu0 %2257  ;;  %v2270_v43 = vpop.permute.xlu1 %2269 }
 0x55a   : > { %v2298_v39 = vsel %vm395_vm1, %v2252_v41, %v2258_v38 }
 0x55b   : > { %v2301_v31 = vsel %vm2299_vm14, %v2298_v39, %v2264_v22 }
 0x55c   : > { %v2304_v44 = vsel %vm2302_vm15, %v2301_v31, %v2270_v43 }
 0x561   : > { %v2276_v0 = vpop.permute.xlu0 %2275  ;;  %v2288_v13 = vpop.permute.xlu1 %2287 }
 0x562   : > { %v2307_v45 = vsel %vm2305_vm0, %v2304_v44, %v2276_v0 }
 0x563   : > { %v2310_v46 = vsel %vm2308_vm2, %v2307_v45, %v2282_v27 }
 0x564   : > { %v2313_v60 = vsel %vm2311_vm3, %v2310_v46, %v2288_v13 }
 0x569   : > { %v2294_v23 = vpop.permute.xlu0 %2293 }
 0x56a   : > { %v2316_v14 = vsel %vm2314_vm4, %v2313_v60, %v2294_v23 }
 0x56b   : > { %2319 = vst.msk [vmem:[%s332_s27 + $0x8] sm:$0xff] %vm2317_vm5, %v2316_v14 }
 0x56c PF: > { %s19_s30 = sadd.s32 1, %s2532_s30  }
 0x56d   : > { %p16_p4 = scmp.ge.s32.totalorder %s19_s30, 4  }
 0x56f   :  { %18 = sbr.rel (!%p16_p4) target bundleno = 1 (0x1), region = 105 }

</bundles_post_ra>
